<compile_context>
chip_gen: v7x
topology: tpu7x:2x2x1
jax: 0.10.0
libtpu: 0.0.40
codegen_flags: <defaults>
</compile_context>

<pallas_src>
import numpy as np
import jax
import jax.numpy as jnp
from jax import lax
from jax.experimental import pallas as pl
from jax.experimental.pallas import tpu as pltpu


# ----------------------------------------------------------------------------
# host-side operator construction (glue)
# ----------------------------------------------------------------------------
def _bilinear_matrix(n_in, n_out):
    """align_corners=True bilinear interpolation operator, shape (n_out, n_in)."""
    A = np.zeros((n_out, n_in), np.float32)
    for i in range(n_out):
        src = 0.0 if n_out == 1 else i * (n_in - 1) / (n_out - 1)
        i0 = int(np.floor(src))
        i1 = min(i0 + 1, n_in - 1)
        f = src - i0
        A[i, i0] += 1.0 - f
        A[i, i1] += f
    return A


def _build_upsample_ops(Hin, Win, Hs, Ws):
    """Row/col interpolation operators with the module's F.pad folded in.

    NOTE: reproduces the reference F.pad argument order exactly
    (h_pad is applied along W, w_pad along H, as written in the PyTorch code).
    """
    Hup, Wup = 2 * Hin, 2 * Win
    h_pad = Hs - Hup
    w_pad = Ws - Wup
    Ah = np.zeros((Hs, Hin), np.float32)
    Ah[w_pad // 2: w_pad // 2 + Hup, :] = _bilinear_matrix(Hin, Hup)
    Aw = np.zeros((Ws, Win), np.float32)
    Aw[h_pad // 2: h_pad // 2 + Wup, :] = _bilinear_matrix(Win, Wup)
    return Ah, Aw


# ----------------------------------------------------------------------------
# Pallas kernel
# ----------------------------------------------------------------------------
def _make_upblock_kernel(NB, Cin, Cout, Hin, Win, Hs, Ws, compute_dtype):
    NC = NB * Cin                 # channel planes handled per grid step
    L = Hs * Ws                   # flattened spatial size
    C0 = Ws                       # lane offset of the dh=0 copy inside zk

    def kernel(x_ref, skip_ref, ah_ref, awt_ref, wk_ref, gs_ref, gb_ref,
               out_ref, zp_ref, zk_ref):
        f32 = jnp.float32

        # -------- bilinear upsample (align_corners=True), separable, MXU --------
        # W interpolation, batched over the NB*Cin channel planes:
        #   (NC, Hin, Win) @ (Win, Ws) -> (NC, Hin, Ws)
        x3 = x_ref[...]
        awb = jnp.broadcast_to(awt_ref[...], (NC, Win, Ws))
        u = lax.dot_general(x3, awb, (((2,), (1,)), ((0,), (0,))),
                            preferred_element_type=f32)
        # H interpolation: (Hs, Hin) @ (NC, Hin, Ws) -> (NC, Hs, Ws)
        ahb = jnp.broadcast_to(ah_ref[...], (NC, Hs, Hin))
        up = lax.dot_general(ahb, u.astype(compute_dtype),
                             (((2,), (1,)), ((0,), (0,))),
                             preferred_element_type=f32)

        # -------- skip connection (skip_method == 'sum'), f32 --------
        z = skip_ref[...].astype(f32) + up                 # (NC, Hs, Ws)

        # stage z once in plane layout (cheap; lets the flattening below be
        # plain rectangular VMEM loads/stores instead of in-register reshapes)
        zp_ref[...] = z.reshape(NB, Cin, Hs, Ws).astype(zp_ref.dtype)

        # -------- build the lane-padded flat slab with 3 dh-shifted copies -------
        # only the two pad bands that are read but never overwritten are cleared
        # (the data region is fully rewritten every step).
        zero_band = jnp.zeros((NB, 3 * Cin, Ws + 1), zk_ref.dtype)
        zk_ref[:, :, C0 - 1:C0 + Ws] = zero_band
        zk_ref[:, :, L:L + Ws + 1] = zero_band
        for h in range(Hs):
            row = zp_ref[:, :, h, :]                       # (NB, Cin, Ws)
            for g in range(3):                             # g <-> dh = g - 1
                s = (h + 2 - g) * Ws
                zk_ref[:, g * Cin:(g + 1) * Cin, s:s + Ws] = row

        # -------- 3x3 conv: 3 channel-mixing matmuls (kh taps stacked on K) ------
        lane = lax.broadcasted_iota(jnp.int32, (1, L), 1)
        w_id = lane % Ws
        ok_left = w_id > 0            # taps reading w-1 are invalid at w == 0
        ok_right = w_id < Ws - 1      # taps reading w+1 are invalid at w == Ws-1

        gscale = gs_ref[...]          # (Cout, 1) fused BN scale
        gshift = gb_ref[...]          # (Cout, 1) fused conv-bias + BN shift

        for n in range(NB):           # NB is small (batch tile), unrolled
            acc = None
            for dwi, dw in enumerate((-1, 0, 1)):
                patch = zk_ref[n, :, C0 + dw:C0 + dw + L]   # (3*Cin, L)
                t = lax.dot_general(wk_ref[dwi], patch,
                                    (((1,), (0,)), ((), ())),
                                    preferred_element_type=f32)  # (Cout, L)
                if dw == -1:
                    t = jnp.where(ok_left, t, 0.0)
                elif dw == 1:
                    t = jnp.where(ok_right, t, 0.0)
                acc = t if acc is None else acc + t

            # fused conv-bias + BatchNorm (inference) + ReLU, f32 epilogue
            y = acc * gscale + gshift
            out_ref[n] = jnp.maximum(y, 0.0).astype(out_ref.dtype)

    return kernel


# ----------------------------------------------------------------------------
# wrapper
# ----------------------------------------------------------------------------
def upblock_forward(x_skip, x, conv_w, conv_b, bn_gamma, bn_beta,
                    bn_mean, bn_var, eps=1e-5, batch_block=None, use_bf16=True):
    N, Cin, Hin, Win = x.shape
    Nk, Cs, Hs, Ws = x_skip.shape
    assert (N, Cin) == (Nk, Cs), "batch/channel mismatch between x and x_skip"
    assert conv_w.shape[1] == Cin
    assert Hs >= 2 and Ws >= 2
    assert 2 * Hin <= Hs and 2 * Win <= Ws
    Cout = conv_w.shape[0]
    L = Hs * Ws

    cdt = jnp.bfloat16 if use_bf16 else jnp.float32
    NB = N if batch_block is None else batch_block
    assert N % NB == 0

    # upsample / pad operators (keeps the reference module's F.pad axis order)
    Ah, Aw = _build_upsample_ops(Hin, Win, Hs, Ws)        # (Hs,Hin), (Ws,Win)
    AwT = np.ascontiguousarray(Aw.T)                      # (Win, Ws)

    # conv weights: per-kw (Cout, 3*Cin) channel mixers (kh taps stacked on K)
    w_np = np.asarray(conv_w, np.float32)                 # (Cout, Cin, 3, 3)
    Wk = np.ascontiguousarray(w_np.transpose(3, 0, 2, 1)).reshape(3, Cout, 3 * Cin)

    # fold conv bias + BatchNorm (inference) into one per-channel scale/shift
    scale = np.asarray(bn_gamma, np.float32) / np.sqrt(
        np.asarray(bn_var, np.float32) + eps)
    shift = np.asarray(bn_beta, np.float32) - np.asarray(bn_mean, np.float32) * scale
    gs = scale.reshape(Cout, 1)
    gb = (np.asarray(conv_b, np.float32) * scale + shift).reshape(Cout, 1)

    # NCHW-native kernel layouts (plain reshapes, no host-side transposes)
    x_in = jnp.asarray(x).reshape(N * Cin, Hin, Win).astype(cdt)
    skip_in = jnp.asarray(x_skip).reshape(N * Cin, Hs, Ws).astype(cdt)

    WL = L + 2 * Ws + 1          # flat slab width incl. lane padding
    kernel = _make_upblock_kernel(NB, Cin, Cout, Hin, Win, Hs, Ws, cdt)

    out = pl.pallas_call(
        kernel,
        out_shape=jax.ShapeDtypeStruct((N, Cout, L), jnp.float32),
        grid_spec=pltpu.PrefetchScalarGridSpec(
            num_scalar_prefetch=0,
            grid=(N // NB,),
            in_specs=[
                pl.BlockSpec((NB * Cin, Hin, Win), lambda b: (b, 0, 0)),
                pl.BlockSpec((NB * Cin, Hs, Ws), lambda b: (b, 0, 0)),
                # grid-invariant operands (interpolation matrices, conv taps,
                # fused scale/shift).
                # TODO(synk): single-buffer these (pipeline_mode=pl.Buffered(1))
                # once that kwarg is available in the target JAX version.
                pl.BlockSpec((Hs, Hin), lambda b: (0, 0)),
                pl.BlockSpec((Win, Ws), lambda b: (0, 0)),
                pl.BlockSpec((3, Cout, 3 * Cin), lambda b: (0, 0, 0)),
                pl.BlockSpec((Cout, 1), lambda b: (0, 0)),
                pl.BlockSpec((Cout, 1), lambda b: (0, 0)),
            ],
            out_specs=pl.BlockSpec((NB, Cout, L), lambda b: (b, 0, 0)),
            scratch_shapes=[
                pltpu.VMEM((NB, Cin, Hs, Ws), cdt),      # staged (up + skip)
                pltpu.VMEM((NB, 3 * Cin, WL), cdt),      # padded, dh-shifted slab
            ],
        ),
        compiler_params=pltpu.CompilerParams(
            dimension_semantics=("parallel",),
            vmem_limit_bytes=32 * 1024 * 1024,
        ),
    )(x_in, skip_in,
      jnp.asarray(Ah).astype(cdt), jnp.asarray(AwT).astype(cdt),
      jnp.asarray(Wk).astype(cdt),
      jnp.asarray(gs), jnp.asarray(gb))

    # (N, Cout, Hs*Ws) -> NCHW, a free reshape
    return out.reshape(N, Cout, Hs, Ws)


# ----------------------------------------------------------------------------
# pure-JAX reference (for a numerical smoke check)
# ----------------------------------------------------------------------------
def upblock_reference(x_skip, x, conv_w, conv_b, bn_gamma, bn_beta,
                      bn_mean, bn_var, eps=1e-5):
    N, Cin, Hin, Win = x.shape
    _, _, Hs, Ws = x_skip.shape
    Ah, Aw = _build_upsample_ops(Hin, Win, Hs, Ws)
    hp = jax.lax.Precision.HIGHEST
    up = jnp.einsum('Hh,nchw->ncHw', jnp.asarray(Ah), x, precision=hp)
    up = jnp.einsum('Ww,ncHw->ncHW', jnp.asarray(Aw), up, precision=hp)
    z = x_skip + up
    y = jax.lax.conv_general_dilated(
        z, conv_w, window_strides=(1, 1), padding=((1, 1), (1, 1)),
        dimension_numbers=('NCHW', 'OIHW', 'NCHW'), precision=hp)
    scale = bn_gamma / jnp.sqrt(bn_var + eps)
    shift = bn_beta - bn_mean * scale
    y = (y + conv_b[None, :, None, None]) * scale[None, :, None, None] \
        + shift[None, :, None, None]
    return jnp.maximum(y, 0.0)


if __name__ == "__main__":
    N, Cin, Cout = 2, 4, 4
    Hs = Ws = 16          # skip-connection spatial size
    Hin = Win = 8         # low-resolution input spatial size (upsampled 2x)

    key = jax.random.PRNGKey(0)
    ks = jax.random.split(key, 8)
    x_skip = jax.random.normal(ks[0], (N, Cin, Hs, Ws), jnp.float32)
    x = jax.random.normal(ks[1], (N, Cin, Hin, Win), jnp.float32)

    # deterministic synthetic parameters (UpBlock(in=4, out=4, middle=[], sum skip))
    conv_w = 0.2 * jax.random.normal(ks[2], (Cout, Cin, 3, 3), jnp.float32)
    conv_b = 0.1 * jax.random.normal(ks[3], (Cout,), jnp.float32)
    bn_gamma = 1.0 + 0.1 * jax.random.normal(ks[4], (Cout,), jnp.float32)
    bn_beta = 0.1 * jax.random.normal(ks[5], (Cout,), jnp.float32)
    bn_mean = 0.05 * jax.random.normal(ks[6], (Cout,), jnp.float32)
    bn_var = 1.0 + 0.1 * jax.random.uniform(ks[7], (Cout,), jnp.float32)

    args = (x_skip, x, conv_w, conv_b, bn_gamma, bn_beta, bn_mean, bn_var)

    ref = jax.block_until_ready(upblock_reference(*args))

    # f32 path (tight check of layout / operator construction)
    out_f32 = jax.block_until_ready(upblock_forward(*args, use_bf16=False))
    assert out_f32.shape == (N, Cout, Hs, Ws)
    err_f32 = float(jnp.max(jnp.abs(out_f32 - ref)))
    assert err_f32 < 5e-2, f"f32 path max abs error too large: {err_f32}"

    # bf16 MXU-input path (perf path recommended by the review; looser tol)
    out_bf16 = jax.block_until_ready(upblock_forward(*args, use_bf16=True))
    err_bf16 = float(jnp.max(jnp.abs(out_bf16 - ref)))
    assert err_bf16 < 2.5e-1, f"bf16 path max abs error too large: {err_bf16}"

    # batch-tiled grid path (grid = (N,), one batch element per step)
    out_tiled = jax.block_until_ready(
        upblock_forward(*args, use_bf16=True, batch_block=1))
    err_tiled = float(jnp.max(jnp.abs(out_tiled - ref)))
    assert err_tiled < 2.5e-1, f"tiled path max abs error too large: {err_tiled}"

    print("KERNEL_OK")
</pallas_src>

<mosaic_0001>
module attributes {stable_mosaic.version = 11 : i64} {
  func.func @kernel(%arg0: i32, %arg1: memref<8x8x8xf32, #tpu.memory_space<vmem>>, %arg2: memref<8x16x16xf32, #tpu.memory_space<vmem>>, %arg3: memref<16x8xf32, #tpu.memory_space<vmem>>, %arg4: memref<8x16xf32, #tpu.memory_space<vmem>>, %arg5: memref<3x4x12xf32, #tpu.memory_space<vmem>>, %arg6: memref<4x1xf32, #tpu.memory_space<vmem>>, %arg7: memref<4x1xf32, #tpu.memory_space<vmem>>, %arg8: memref<2x4x256xf32, #tpu.memory_space<vmem>>, %arg9: memref<2x4x16x16xf32, #tpu.memory_space<vmem>>, %arg10: memref<2x12x289xf32, #tpu.memory_space<vmem>>) attributes {dimension_semantics = [#tpu.dimension_semantics<parallel>], iteration_bounds = array<i64: 1>, scalar_prefetch = 0 : i64, scratch_operands = 2 : i64, tpu.core_type = #tpu.core_type<tc>, window_params = [{transform_indices = @transform_0, window_bounds = array<i64: 8, 8, 8>}, {transform_indices = @transform_1, window_bounds = array<i64: 8, 16, 16>}, {pipeline_mode = #tpu.pipeline_mode<synchronous>, transform_indices = @transform_2, window_bounds = array<i64: 16, 8>}, {pipeline_mode = #tpu.pipeline_mode<synchronous>, transform_indices = @transform_3, window_bounds = array<i64: 8, 16>}, {pipeline_mode = #tpu.pipeline_mode<synchronous>, transform_indices = @transform_4, window_bounds = array<i64: 3, 4, 12>}, {pipeline_mode = #tpu.pipeline_mode<synchronous>, transform_indices = @transform_5, window_bounds = array<i64: 4, 1>}, {pipeline_mode = #tpu.pipeline_mode<synchronous>, transform_indices = @transform_6, window_bounds = array<i64: 4, 1>}, {transform_indices = @transform_7, window_bounds = array<i64: 2, 4, 256>}]} {
    %c0 = arith.constant 0 : index
    %c0_0 = arith.constant 0 : index
    %c0_1 = arith.constant 0 : index
    %0 = vector.load %arg1[%c0, %c0_0, %c0_1] : memref<8x8x8xf32, #tpu.memory_space<vmem>>, vector<8x8x8xf32>
    %c0_2 = arith.constant 0 : index
    %c0_3 = arith.constant 0 : index
    %1 = vector.load %arg4[%c0_2, %c0_3] : memref<8x16xf32, #tpu.memory_space<vmem>>, vector<8x16xf32>
    %2 = vector.shape_cast %1 : vector<8x16xf32> to vector<1x8x16xf32>
    %3 = vector.broadcast %2 : vector<1x8x16xf32> to vector<8x8x16xf32>
    %cst = arith.constant dense<0.000000e+00> : vector<8x8x16xf32>
    %4 = tpu.matmul %0, %3, %cst {dimension_numbers = #tpu.dot_dimension_numbers<[2], [1], [1], [2], [0, 0, 0, 1, 1, 2], [0], [0]>} : vector<8x8x8xf32>, vector<8x8x16xf32>, vector<8x8x16xf32> -> vector<8x8x16xf32>
    %c0_4 = arith.constant 0 : index
    %c0_5 = arith.constant 0 : index
    %5 = vector.load %arg3[%c0_4, %c0_5] : memref<16x8xf32, #tpu.memory_space<vmem>>, vector<16x8xf32>
    %6 = vector.shape_cast %5 : vector<16x8xf32> to vector<1x16x8xf32>
    %7 = vector.broadcast %6 : vector<1x16x8xf32> to vector<8x16x8xf32>
    %cst_6 = arith.constant dense<0.000000e+00> : vector<8x16x16xf32>
    %8 = tpu.matmul %7, %4, %cst_6 {dimension_numbers = #tpu.dot_dimension_numbers<[2], [1], [1], [2], [0, 0, 0, 1, 1, 2], [0], [0]>} : vector<8x16x8xf32>, vector<8x8x16xf32>, vector<8x16x16xf32> -> vector<8x16x16xf32>
    %c0_7 = arith.constant 0 : index
    %c0_8 = arith.constant 0 : index
    %c0_9 = arith.constant 0 : index
    %9 = vector.load %arg2[%c0_7, %c0_8, %c0_9] : memref<8x16x16xf32, #tpu.memory_space<vmem>>, vector<8x16x16xf32>
    %10 = arith.addf %9, %8 : vector<8x16x16xf32>
    %11 = vector.shape_cast %10 : vector<8x16x16xf32> to vector<2x4x16x16xf32>
    %c0_10 = arith.constant 0 : index
    %c0_11 = arith.constant 0 : index
    %c0_12 = arith.constant 0 : index
    %c0_13 = arith.constant 0 : index
    %12 = vector.load %arg9[%c0_10, %c0_11, %c0_12, %c0_13] : memref<2x4x16x16xf32, #tpu.memory_space<vmem>>, vector<2x4x16x16xf32>
    tpu.vector_store %arg9[%c0_10, %c0_11, %c0_12, %c0_13], %11 {strides = array<i32>} : memref<2x4x16x16xf32, #tpu.memory_space<vmem>>, vector<2x4x16x16xf32>,
    %cst_14 = arith.constant 0.000000e+00 : f32
    %13 = vector.broadcast %cst_14 : f32 to vector<2x12x17xf32>
    %c0_15 = arith.constant 0 : index
    %c0_16 = arith.constant 0 : index
    %c15 = arith.constant 15 : index
    %14 = vector.load %arg10[%c0_15, %c0_16, %c15] : memref<2x12x289xf32, #tpu.memory_space<vmem>>, vector<2x12x17xf32>
    tpu.vector_store %arg10[%c0_15, %c0_16, %c15], %13 {strides = array<i32>} : memref<2x12x289xf32, #tpu.memory_space<vmem>>, vector<2x12x17xf32>,
    %c0_17 = arith.constant 0 : index
    %c0_18 = arith.constant 0 : index
    %c256 = arith.constant 256 : index
    %15 = vector.load %arg10[%c0_17, %c0_18, %c256] : memref<2x12x289xf32, #tpu.memory_space<vmem>>, vector<2x12x17xf32>
    tpu.vector_store %arg10[%c0_17, %c0_18, %c256], %13 {strides = array<i32>} : memref<2x12x289xf32, #tpu.memory_space<vmem>>, vector<2x12x17xf32>,
    %c0_19 = arith.constant 0 : index
    %c0_20 = arith.constant 0 : index
    %c0_21 = arith.constant 0 : index
    %c0_22 = arith.constant 0 : index
    %16 = vector.load %arg9[%c0_19, %c0_20, %c0_21, %c0_22] : memref<2x4x16x16xf32, #tpu.memory_space<vmem>>, vector<2x4x1x16xf32>
    %17 = vector.shape_cast %16 : vector<2x4x1x16xf32> to vector<2x4x16xf32>
    %c0_23 = arith.constant 0 : index
    %c0_24 = arith.constant 0 : index
    %c32 = arith.constant 32 : index
    %18 = vector.load %arg10[%c0_23, %c0_24, %c32] : memref<2x12x289xf32, #tpu.memory_space<vmem>>, vector<2x4x16xf32>
    tpu.vector_store %arg10[%c0_23, %c0_24, %c32], %17 {strides = array<i32>} : memref<2x12x289xf32, #tpu.memory_space<vmem>>, vector<2x4x16xf32>,
    %c0_25 = arith.constant 0 : index
    %c4 = arith.constant 4 : index
    %c16 = arith.constant 16 : index
    %19 = vector.load %arg10[%c0_25, %c4, %c16] : memref<2x12x289xf32, #tpu.memory_space<vmem>>, vector<2x4x16xf32>
    tpu.vector_store %arg10[%c0_25, %c4, %c16], %17 {strides = array<i32>} : memref<2x12x289xf32, #tpu.memory_space<vmem>>, vector<2x4x16xf32>,
    %c0_26 = arith.constant 0 : index
    %c8 = arith.constant 8 : index
    %c0_27 = arith.constant 0 : index
    %20 = vector.load %arg10[%c0_26, %c8, %c0_27] : memref<2x12x289xf32, #tpu.memory_space<vmem>>, vector<2x4x16xf32>
    tpu.vector_store %arg10[%c0_26, %c8, %c0_27], %17 {strides = array<i32>} : memref<2x12x289xf32, #tpu.memory_space<vmem>>, vector<2x4x16xf32>,
    %c0_28 = arith.constant 0 : index
    %c0_29 = arith.constant 0 : index
    %c1 = arith.constant 1 : index
    %c0_30 = arith.constant 0 : index
    %21 = vector.load %arg9[%c0_28, %c0_29, %c1, %c0_30] : memref<2x4x16x16xf32, #tpu.memory_space<vmem>>, vector<2x4x1x16xf32>
    %22 = vector.shape_cast %21 : vector<2x4x1x16xf32> to vector<2x4x16xf32>
    %c0_31 = arith.constant 0 : index
    %c0_32 = arith.constant 0 : index
    %c48 = arith.constant 48 : index
    %23 = vector.load %arg10[%c0_31, %c0_32, %c48] : memref<2x12x289xf32, #tpu.memory_space<vmem>>, vector<2x4x16xf32>
    tpu.vector_store %arg10[%c0_31, %c0_32, %c48], %22 {strides = array<i32>} : memref<2x12x289xf32, #tpu.memory_space<vmem>>, vector<2x4x16xf32>,
    %c0_33 = arith.constant 0 : index
    %c4_34 = arith.constant 4 : index
    %c32_35 = arith.constant 32 : index
    %24 = vector.load %arg10[%c0_33, %c4_34, %c32_35] : memref<2x12x289xf32, #tpu.memory_space<vmem>>, vector<2x4x16xf32>
    tpu.vector_store %arg10[%c0_33, %c4_34, %c32_35], %22 {strides = array<i32>} : memref<2x12x289xf32, #tpu.memory_space<vmem>>, vector<2x4x16xf32>,
    %c0_36 = arith.constant 0 : index
    %c8_37 = arith.constant 8 : index
    %c16_38 = arith.constant 16 : index
    %25 = vector.load %arg10[%c0_36, %c8_37, %c16_38] : memref<2x12x289xf32, #tpu.memory_space<vmem>>, vector<2x4x16xf32>
    tpu.vector_store %arg10[%c0_36, %c8_37, %c16_38], %22 {strides = array<i32>} : memref<2x12x289xf32, #tpu.memory_space<vmem>>, vector<2x4x16xf32>,
    %c0_39 = arith.constant 0 : index
    %c0_40 = arith.constant 0 : index
    %c2 = arith.constant 2 : index
    %c0_41 = arith.constant 0 : index
    %26 = vector.load %arg9[%c0_39, %c0_40, %c2, %c0_41] : memref<2x4x16x16xf32, #tpu.memory_space<vmem>>, vector<2x4x1x16xf32>
    %27 = vector.shape_cast %26 : vector<2x4x1x16xf32> to vector<2x4x16xf32>
    %c0_42 = arith.constant 0 : index
    %c0_43 = arith.constant 0 : index
    %c64 = arith.constant 64 : index
    %28 = vector.load %arg10[%c0_42, %c0_43, %c64] : memref<2x12x289xf32, #tpu.memory_space<vmem>>, vector<2x4x16xf32>
    tpu.vector_store %arg10[%c0_42, %c0_43, %c64], %27 {strides = array<i32>} : memref<2x12x289xf32, #tpu.memory_space<vmem>>, vector<2x4x16xf32>,
    %c0_44 = arith.constant 0 : index
    %c4_45 = arith.constant 4 : index
    %c48_46 = arith.constant 48 : index
    %29 = vector.load %arg10[%c0_44, %c4_45, %c48_46] : memref<2x12x289xf32, #tpu.memory_space<vmem>>, vector<2x4x16xf32>
    tpu.vector_store %arg10[%c0_44, %c4_45, %c48_46], %27 {strides = array<i32>} : memref<2x12x289xf32, #tpu.memory_space<vmem>>, vector<2x4x16xf32>,
    %c0_47 = arith.constant 0 : index
    %c8_48 = arith.constant 8 : index
    %c32_49 = arith.constant 32 : index
    %30 = vector.load %arg10[%c0_47, %c8_48, %c32_49] : memref<2x12x289xf32, #tpu.memory_space<vmem>>, vector<2x4x16xf32>
    tpu.vector_store %arg10[%c0_47, %c8_48, %c32_49], %27 {strides = array<i32>} : memref<2x12x289xf32, #tpu.memory_space<vmem>>, vector<2x4x16xf32>,
    %c0_50 = arith.constant 0 : index
    %c0_51 = arith.constant 0 : index
    %c3 = arith.constant 3 : index
    %c0_52 = arith.constant 0 : index
    %31 = vector.load %arg9[%c0_50, %c0_51, %c3, %c0_52] : memref<2x4x16x16xf32, #tpu.memory_space<vmem>>, vector<2x4x1x16xf32>
    %32 = vector.shape_cast %31 : vector<2x4x1x16xf32> to vector<2x4x16xf32>
    %c0_53 = arith.constant 0 : index
    %c0_54 = arith.constant 0 : index
    %c80 = arith.constant 80 : index
    %33 = vector.load %arg10[%c0_53, %c0_54, %c80] : memref<2x12x289xf32, #tpu.memory_space<vmem>>, vector<2x4x16xf32>
    tpu.vector_store %arg10[%c0_53, %c0_54, %c80], %32 {strides = array<i32>} : memref<2x12x289xf32, #tpu.memory_space<vmem>>, vector<2x4x16xf32>,
    %c0_55 = arith.constant 0 : index
    %c4_56 = arith.constant 4 : index
    %c64_57 = arith.constant 64 : index
    %34 = vector.load %arg10[%c0_55, %c4_56, %c64_57] : memref<2x12x289xf32, #tpu.memory_space<vmem>>, vector<2x4x16xf32>
    tpu.vector_store %arg10[%c0_55, %c4_56, %c64_57], %32 {strides = array<i32>} : memref<2x12x289xf32, #tpu.memory_space<vmem>>, vector<2x4x16xf32>,
    %c0_58 = arith.constant 0 : index
    %c8_59 = arith.constant 8 : index
    %c48_60 = arith.constant 48 : index
    %35 = vector.load %arg10[%c0_58, %c8_59, %c48_60] : memref<2x12x289xf32, #tpu.memory_space<vmem>>, vector<2x4x16xf32>
    tpu.vector_store %arg10[%c0_58, %c8_59, %c48_60], %32 {strides = array<i32>} : memref<2x12x289xf32, #tpu.memory_space<vmem>>, vector<2x4x16xf32>,
    %c0_61 = arith.constant 0 : index
    %c0_62 = arith.constant 0 : index
    %c4_63 = arith.constant 4 : index
    %c0_64 = arith.constant 0 : index
    %36 = vector.load %arg9[%c0_61, %c0_62, %c4_63, %c0_64] : memref<2x4x16x16xf32, #tpu.memory_space<vmem>>, vector<2x4x1x16xf32>
    %37 = vector.shape_cast %36 : vector<2x4x1x16xf32> to vector<2x4x16xf32>
    %c0_65 = arith.constant 0 : index
    %c0_66 = arith.constant 0 : index
    %c96 = arith.constant 96 : index
    %38 = vector.load %arg10[%c0_65, %c0_66, %c96] : memref<2x12x289xf32, #tpu.memory_space<vmem>>, vector<2x4x16xf32>
    tpu.vector_store %arg10[%c0_65, %c0_66, %c96], %37 {strides = array<i32>} : memref<2x12x289xf32, #tpu.memory_space<vmem>>, vector<2x4x16xf32>,
    %c0_67 = arith.constant 0 : index
    %c4_68 = arith.constant 4 : index
    %c80_69 = arith.constant 80 : index
    %39 = vector.load %arg10[%c0_67, %c4_68, %c80_69] : memref<2x12x289xf32, #tpu.memory_space<vmem>>, vector<2x4x16xf32>
    tpu.vector_store %arg10[%c0_67, %c4_68, %c80_69], %37 {strides = array<i32>} : memref<2x12x289xf32, #tpu.memory_space<vmem>>, vector<2x4x16xf32>,
    %c0_70 = arith.constant 0 : index
    %c8_71 = arith.constant 8 : index
    %c64_72 = arith.constant 64 : index
    %40 = vector.load %arg10[%c0_70, %c8_71, %c64_72] : memref<2x12x289xf32, #tpu.memory_space<vmem>>, vector<2x4x16xf32>
    tpu.vector_store %arg10[%c0_70, %c8_71, %c64_72], %37 {strides = array<i32>} : memref<2x12x289xf32, #tpu.memory_space<vmem>>, vector<2x4x16xf32>,
    %c0_73 = arith.constant 0 : index
    %c0_74 = arith.constant 0 : index
    %c5 = arith.constant 5 : index
    %c0_75 = arith.constant 0 : index
    %41 = vector.load %arg9[%c0_73, %c0_74, %c5, %c0_75] : memref<2x4x16x16xf32, #tpu.memory_space<vmem>>, vector<2x4x1x16xf32>
    %42 = vector.shape_cast %41 : vector<2x4x1x16xf32> to vector<2x4x16xf32>
    %c0_76 = arith.constant 0 : index
    %c0_77 = arith.constant 0 : index
    %c112 = arith.constant 112 : index
    %43 = vector.load %arg10[%c0_76, %c0_77, %c112] : memref<2x12x289xf32, #tpu.memory_space<vmem>>, vector<2x4x16xf32>
    tpu.vector_store %arg10[%c0_76, %c0_77, %c112], %42 {strides = array<i32>} : memref<2x12x289xf32, #tpu.memory_space<vmem>>, vector<2x4x16xf32>,
    %c0_78 = arith.constant 0 : index
    %c4_79 = arith.constant 4 : index
    %c96_80 = arith.constant 96 : index
    %44 = vector.load %arg10[%c0_78, %c4_79, %c96_80] : memref<2x12x289xf32, #tpu.memory_space<vmem>>, vector<2x4x16xf32>
    tpu.vector_store %arg10[%c0_78, %c4_79, %c96_80], %42 {strides = array<i32>} : memref<2x12x289xf32, #tpu.memory_space<vmem>>, vector<2x4x16xf32>,
    %c0_81 = arith.constant 0 : index
    %c8_82 = arith.constant 8 : index
    %c80_83 = arith.constant 80 : index
    %45 = vector.load %arg10[%c0_81, %c8_82, %c80_83] : memref<2x12x289xf32, #tpu.memory_space<vmem>>, vector<2x4x16xf32>
    tpu.vector_store %arg10[%c0_81, %c8_82, %c80_83], %42 {strides = array<i32>} : memref<2x12x289xf32, #tpu.memory_space<vmem>>, vector<2x4x16xf32>,
    %c0_84 = arith.constant 0 : index
    %c0_85 = arith.constant 0 : index
    %c6 = arith.constant 6 : index
    %c0_86 = arith.constant 0 : index
    %46 = vector.load %arg9[%c0_84, %c0_85, %c6, %c0_86] : memref<2x4x16x16xf32, #tpu.memory_space<vmem>>, vector<2x4x1x16xf32>
    %47 = vector.shape_cast %46 : vector<2x4x1x16xf32> to vector<2x4x16xf32>
    %c0_87 = arith.constant 0 : index
    %c0_88 = arith.constant 0 : index
    %c128 = arith.constant 128 : index
    %48 = vector.load %arg10[%c0_87, %c0_88, %c128] : memref<2x12x289xf32, #tpu.memory_space<vmem>>, vector<2x4x16xf32>
    tpu.vector_store %arg10[%c0_87, %c0_88, %c128], %47 {strides = array<i32>} : memref<2x12x289xf32, #tpu.memory_space<vmem>>, vector<2x4x16xf32>,
    %c0_89 = arith.constant 0 : index
    %c4_90 = arith.constant 4 : index
    %c112_91 = arith.constant 112 : index
    %49 = vector.load %arg10[%c0_89, %c4_90, %c112_91] : memref<2x12x289xf32, #tpu.memory_space<vmem>>, vector<2x4x16xf32>
    tpu.vector_store %arg10[%c0_89, %c4_90, %c112_91], %47 {strides = array<i32>} : memref<2x12x289xf32, #tpu.memory_space<vmem>>, vector<2x4x16xf32>,
    %c0_92 = arith.constant 0 : index
    %c8_93 = arith.constant 8 : index
    %c96_94 = arith.constant 96 : index
    %50 = vector.load %arg10[%c0_92, %c8_93, %c96_94] : memref<2x12x289xf32, #tpu.memory_space<vmem>>, vector<2x4x16xf32>
    tpu.vector_store %arg10[%c0_92, %c8_93, %c96_94], %47 {strides = array<i32>} : memref<2x12x289xf32, #tpu.memory_space<vmem>>, vector<2x4x16xf32>,
    %c0_95 = arith.constant 0 : index
    %c0_96 = arith.constant 0 : index
    %c7 = arith.constant 7 : index
    %c0_97 = arith.constant 0 : index
    %51 = vector.load %arg9[%c0_95, %c0_96, %c7, %c0_97] : memref<2x4x16x16xf32, #tpu.memory_space<vmem>>, vector<2x4x1x16xf32>
    %52 = vector.shape_cast %51 : vector<2x4x1x16xf32> to vector<2x4x16xf32>
    %c0_98 = arith.constant 0 : index
    %c0_99 = arith.constant 0 : index
    %c144 = arith.constant 144 : index
    %53 = vector.load %arg10[%c0_98, %c0_99, %c144] : memref<2x12x289xf32, #tpu.memory_space<vmem>>, vector<2x4x16xf32>
    tpu.vector_store %arg10[%c0_98, %c0_99, %c144], %52 {strides = array<i32>} : memref<2x12x289xf32, #tpu.memory_space<vmem>>, vector<2x4x16xf32>,
    %c0_100 = arith.constant 0 : index
    %c4_101 = arith.constant 4 : index
    %c128_102 = arith.constant 128 : index
    %54 = vector.load %arg10[%c0_100, %c4_101, %c128_102] : memref<2x12x289xf32, #tpu.memory_space<vmem>>, vector<2x4x16xf32>
    tpu.vector_store %arg10[%c0_100, %c4_101, %c128_102], %52 {strides = array<i32>} : memref<2x12x289xf32, #tpu.memory_space<vmem>>, vector<2x4x16xf32>,
    %c0_103 = arith.constant 0 : index
    %c8_104 = arith.constant 8 : index
    %c112_105 = arith.constant 112 : index
    %55 = vector.load %arg10[%c0_103, %c8_104, %c112_105] : memref<2x12x289xf32, #tpu.memory_space<vmem>>, vector<2x4x16xf32>
    tpu.vector_store %arg10[%c0_103, %c8_104, %c112_105], %52 {strides = array<i32>} : memref<2x12x289xf32, #tpu.memory_space<vmem>>, vector<2x4x16xf32>,
    %c0_106 = arith.constant 0 : index
    %c0_107 = arith.constant 0 : index
    %c8_108 = arith.constant 8 : index
    %c0_109 = arith.constant 0 : index
    %56 = vector.load %arg9[%c0_106, %c0_107, %c8_108, %c0_109] : memref<2x4x16x16xf32, #tpu.memory_space<vmem>>, vector<2x4x1x16xf32>
    %57 = vector.shape_cast %56 : vector<2x4x1x16xf32> to vector<2x4x16xf32>
    %c0_110 = arith.constant 0 : index
    %c0_111 = arith.constant 0 : index
    %c160 = arith.constant 160 : index
    %58 = vector.load %arg10[%c0_110, %c0_111, %c160] : memref<2x12x289xf32, #tpu.memory_space<vmem>>, vector<2x4x16xf32>
    tpu.vector_store %arg10[%c0_110, %c0_111, %c160], %57 {strides = array<i32>} : memref<2x12x289xf32, #tpu.memory_space<vmem>>, vector<2x4x16xf32>,
    %c0_112 = arith.constant 0 : index
    %c4_113 = arith.constant 4 : index
    %c144_114 = arith.constant 144 : index
    %59 = vector.load %arg10[%c0_112, %c4_113, %c144_114] : memref<2x12x289xf32, #tpu.memory_space<vmem>>, vector<2x4x16xf32>
    tpu.vector_store %arg10[%c0_112, %c4_113, %c144_114], %57 {strides = array<i32>} : memref<2x12x289xf32, #tpu.memory_space<vmem>>, vector<2x4x16xf32>,
    %c0_115 = arith.constant 0 : index
    %c8_116 = arith.constant 8 : index
    %c128_117 = arith.constant 128 : index
    %60 = vector.load %arg10[%c0_115, %c8_116, %c128_117] : memref<2x12x289xf32, #tpu.memory_space<vmem>>, vector<2x4x16xf32>
    tpu.vector_store %arg10[%c0_115, %c8_116, %c128_117], %57 {strides = array<i32>} : memref<2x12x289xf32, #tpu.memory_space<vmem>>, vector<2x4x16xf32>,
    %c0_118 = arith.constant 0 : index
    %c0_119 = arith.constant 0 : index
    %c9 = arith.constant 9 : index
    %c0_120 = arith.constant 0 : index
    %61 = vector.load %arg9[%c0_118, %c0_119, %c9, %c0_120] : memref<2x4x16x16xf32, #tpu.memory_space<vmem>>, vector<2x4x1x16xf32>
    %62 = vector.shape_cast %61 : vector<2x4x1x16xf32> to vector<2x4x16xf32>
    %c0_121 = arith.constant 0 : index
    %c0_122 = arith.constant 0 : index
    %c176 = arith.constant 176 : index
    %63 = vector.load %arg10[%c0_121, %c0_122, %c176] : memref<2x12x289xf32, #tpu.memory_space<vmem>>, vector<2x4x16xf32>
    tpu.vector_store %arg10[%c0_121, %c0_122, %c176], %62 {strides = array<i32>} : memref<2x12x289xf32, #tpu.memory_space<vmem>>, vector<2x4x16xf32>,
    %c0_123 = arith.constant 0 : index
    %c4_124 = arith.constant 4 : index
    %c160_125 = arith.constant 160 : index
    %64 = vector.load %arg10[%c0_123, %c4_124, %c160_125] : memref<2x12x289xf32, #tpu.memory_space<vmem>>, vector<2x4x16xf32>
    tpu.vector_store %arg10[%c0_123, %c4_124, %c160_125], %62 {strides = array<i32>} : memref<2x12x289xf32, #tpu.memory_space<vmem>>, vector<2x4x16xf32>,
    %c0_126 = arith.constant 0 : index
    %c8_127 = arith.constant 8 : index
    %c144_128 = arith.constant 144 : index
    %65 = vector.load %arg10[%c0_126, %c8_127, %c144_128] : memref<2x12x289xf32, #tpu.memory_space<vmem>>, vector<2x4x16xf32>
    tpu.vector_store %arg10[%c0_126, %c8_127, %c144_128], %62 {strides = array<i32>} : memref<2x12x289xf32, #tpu.memory_space<vmem>>, vector<2x4x16xf32>,
    %c0_129 = arith.constant 0 : index
    %c0_130 = arith.constant 0 : index
    %c10 = arith.constant 10 : index
    %c0_131 = arith.constant 0 : index
    %66 = vector.load %arg9[%c0_129, %c0_130, %c10, %c0_131] : memref<2x4x16x16xf32, #tpu.memory_space<vmem>>, vector<2x4x1x16xf32>
    %67 = vector.shape_cast %66 : vector<2x4x1x16xf32> to vector<2x4x16xf32>
    %c0_132 = arith.constant 0 : index
    %c0_133 = arith.constant 0 : index
    %c192 = arith.constant 192 : index
    %68 = vector.load %arg10[%c0_132, %c0_133, %c192] : memref<2x12x289xf32, #tpu.memory_space<vmem>>, vector<2x4x16xf32>
    tpu.vector_store %arg10[%c0_132, %c0_133, %c192], %67 {strides = array<i32>} : memref<2x12x289xf32, #tpu.memory_space<vmem>>, vector<2x4x16xf32>,
    %c0_134 = arith.constant 0 : index
    %c4_135 = arith.constant 4 : index
    %c176_136 = arith.constant 176 : index
    %69 = vector.load %arg10[%c0_134, %c4_135, %c176_136] : memref<2x12x289xf32, #tpu.memory_space<vmem>>, vector<2x4x16xf32>
    tpu.vector_store %arg10[%c0_134, %c4_135, %c176_136], %67 {strides = array<i32>} : memref<2x12x289xf32, #tpu.memory_space<vmem>>, vector<2x4x16xf32>,
    %c0_137 = arith.constant 0 : index
    %c8_138 = arith.constant 8 : index
    %c160_139 = arith.constant 160 : index
    %70 = vector.load %arg10[%c0_137, %c8_138, %c160_139] : memref<2x12x289xf32, #tpu.memory_space<vmem>>, vector<2x4x16xf32>
    tpu.vector_store %arg10[%c0_137, %c8_138, %c160_139], %67 {strides = array<i32>} : memref<2x12x289xf32, #tpu.memory_space<vmem>>, vector<2x4x16xf32>,
    %c0_140 = arith.constant 0 : index
    %c0_141 = arith.constant 0 : index
    %c11 = arith.constant 11 : index
    %c0_142 = arith.constant 0 : index
    %71 = vector.load %arg9[%c0_140, %c0_141, %c11, %c0_142] : memref<2x4x16x16xf32, #tpu.memory_space<vmem>>, vector<2x4x1x16xf32>
    %72 = vector.shape_cast %71 : vector<2x4x1x16xf32> to vector<2x4x16xf32>
    %c0_143 = arith.constant 0 : index
    %c0_144 = arith.constant 0 : index
    %c208 = arith.constant 208 : index
    %73 = vector.load %arg10[%c0_143, %c0_144, %c208] : memref<2x12x289xf32, #tpu.memory_space<vmem>>, vector<2x4x16xf32>
    tpu.vector_store %arg10[%c0_143, %c0_144, %c208], %72 {strides = array<i32>} : memref<2x12x289xf32, #tpu.memory_space<vmem>>, vector<2x4x16xf32>,
    %c0_145 = arith.constant 0 : index
    %c4_146 = arith.constant 4 : index
    %c192_147 = arith.constant 192 : index
    %74 = vector.load %arg10[%c0_145, %c4_146, %c192_147] : memref<2x12x289xf32, #tpu.memory_space<vmem>>, vector<2x4x16xf32>
    tpu.vector_store %arg10[%c0_145, %c4_146, %c192_147], %72 {strides = array<i32>} : memref<2x12x289xf32, #tpu.memory_space<vmem>>, vector<2x4x16xf32>,
    %c0_148 = arith.constant 0 : index
    %c8_149 = arith.constant 8 : index
    %c176_150 = arith.constant 176 : index
    %75 = vector.load %arg10[%c0_148, %c8_149, %c176_150] : memref<2x12x289xf32, #tpu.memory_space<vmem>>, vector<2x4x16xf32>
    tpu.vector_store %arg10[%c0_148, %c8_149, %c176_150], %72 {strides = array<i32>} : memref<2x12x289xf32, #tpu.memory_space<vmem>>, vector<2x4x16xf32>,
    %c0_151 = arith.constant 0 : index
    %c0_152 = arith.constant 0 : index
    %c12 = arith.constant 12 : index
    %c0_153 = arith.constant 0 : index
    %76 = vector.load %arg9[%c0_151, %c0_152, %c12, %c0_153] : memref<2x4x16x16xf32, #tpu.memory_space<vmem>>, vector<2x4x1x16xf32>
    %77 = vector.shape_cast %76 : vector<2x4x1x16xf32> to vector<2x4x16xf32>
    %c0_154 = arith.constant 0 : index
    %c0_155 = arith.constant 0 : index
    %c224 = arith.constant 224 : index
    %78 = vector.load %arg10[%c0_154, %c0_155, %c224] : memref<2x12x289xf32, #tpu.memory_space<vmem>>, vector<2x4x16xf32>
    tpu.vector_store %arg10[%c0_154, %c0_155, %c224], %77 {strides = array<i32>} : memref<2x12x289xf32, #tpu.memory_space<vmem>>, vector<2x4x16xf32>,
    %c0_156 = arith.constant 0 : index
    %c4_157 = arith.constant 4 : index
    %c208_158 = arith.constant 208 : index
    %79 = vector.load %arg10[%c0_156, %c4_157, %c208_158] : memref<2x12x289xf32, #tpu.memory_space<vmem>>, vector<2x4x16xf32>
    tpu.vector_store %arg10[%c0_156, %c4_157, %c208_158], %77 {strides = array<i32>} : memref<2x12x289xf32, #tpu.memory_space<vmem>>, vector<2x4x16xf32>,
    %c0_159 = arith.constant 0 : index
    %c8_160 = arith.constant 8 : index
    %c192_161 = arith.constant 192 : index
    %80 = vector.load %arg10[%c0_159, %c8_160, %c192_161] : memref<2x12x289xf32, #tpu.memory_space<vmem>>, vector<2x4x16xf32>
    tpu.vector_store %arg10[%c0_159, %c8_160, %c192_161], %77 {strides = array<i32>} : memref<2x12x289xf32, #tpu.memory_space<vmem>>, vector<2x4x16xf32>,
    %c0_162 = arith.constant 0 : index
    %c0_163 = arith.constant 0 : index
    %c13 = arith.constant 13 : index
    %c0_164 = arith.constant 0 : index
    %81 = vector.load %arg9[%c0_162, %c0_163, %c13, %c0_164] : memref<2x4x16x16xf32, #tpu.memory_space<vmem>>, vector<2x4x1x16xf32>
    %82 = vector.shape_cast %81 : vector<2x4x1x16xf32> to vector<2x4x16xf32>
    %c0_165 = arith.constant 0 : index
    %c0_166 = arith.constant 0 : index
    %c240 = arith.constant 240 : index
    %83 = vector.load %arg10[%c0_165, %c0_166, %c240] : memref<2x12x289xf32, #tpu.memory_space<vmem>>, vector<2x4x16xf32>
    tpu.vector_store %arg10[%c0_165, %c0_166, %c240], %82 {strides = array<i32>} : memref<2x12x289xf32, #tpu.memory_space<vmem>>, vector<2x4x16xf32>,
    %c0_167 = arith.constant 0 : index
    %c4_168 = arith.constant 4 : index
    %c224_169 = arith.constant 224 : index
    %84 = vector.load %arg10[%c0_167, %c4_168, %c224_169] : memref<2x12x289xf32, #tpu.memory_space<vmem>>, vector<2x4x16xf32>
    tpu.vector_store %arg10[%c0_167, %c4_168, %c224_169], %82 {strides = array<i32>} : memref<2x12x289xf32, #tpu.memory_space<vmem>>, vector<2x4x16xf32>,
    %c0_170 = arith.constant 0 : index
    %c8_171 = arith.constant 8 : index
    %c208_172 = arith.constant 208 : index
    %85 = vector.load %arg10[%c0_170, %c8_171, %c208_172] : memref<2x12x289xf32, #tpu.memory_space<vmem>>, vector<2x4x16xf32>
    tpu.vector_store %arg10[%c0_170, %c8_171, %c208_172], %82 {strides = array<i32>} : memref<2x12x289xf32, #tpu.memory_space<vmem>>, vector<2x4x16xf32>,
    %c0_173 = arith.constant 0 : index
    %c0_174 = arith.constant 0 : index
    %c14 = arith.constant 14 : index
    %c0_175 = arith.constant 0 : index
    %86 = vector.load %arg9[%c0_173, %c0_174, %c14, %c0_175] : memref<2x4x16x16xf32, #tpu.memory_space<vmem>>, vector<2x4x1x16xf32>
    %87 = vector.shape_cast %86 : vector<2x4x1x16xf32> to vector<2x4x16xf32>
    %c0_176 = arith.constant 0 : index
    %c0_177 = arith.constant 0 : index
    %c256_178 = arith.constant 256 : index
    %88 = vector.load %arg10[%c0_176, %c0_177, %c256_178] : memref<2x12x289xf32, #tpu.memory_space<vmem>>, vector<2x4x16xf32>
    tpu.vector_store %arg10[%c0_176, %c0_177, %c256_178], %87 {strides = array<i32>} : memref<2x12x289xf32, #tpu.memory_space<vmem>>, vector<2x4x16xf32>,
    %c0_179 = arith.constant 0 : index
    %c4_180 = arith.constant 4 : index
    %c240_181 = arith.constant 240 : index
    %89 = vector.load %arg10[%c0_179, %c4_180, %c240_181] : memref<2x12x289xf32, #tpu.memory_space<vmem>>, vector<2x4x16xf32>
    tpu.vector_store %arg10[%c0_179, %c4_180, %c240_181], %87 {strides = array<i32>} : memref<2x12x289xf32, #tpu.memory_space<vmem>>, vector<2x4x16xf32>,
    %c0_182 = arith.constant 0 : index
    %c8_183 = arith.constant 8 : index
    %c224_184 = arith.constant 224 : index
    %90 = vector.load %arg10[%c0_182, %c8_183, %c224_184] : memref<2x12x289xf32, #tpu.memory_space<vmem>>, vector<2x4x16xf32>
    tpu.vector_store %arg10[%c0_182, %c8_183, %c224_184], %87 {strides = array<i32>} : memref<2x12x289xf32, #tpu.memory_space<vmem>>, vector<2x4x16xf32>,
    %c0_185 = arith.constant 0 : index
    %c0_186 = arith.constant 0 : index
    %c15_187 = arith.constant 15 : index
    %c0_188 = arith.constant 0 : index
    %91 = vector.load %arg9[%c0_185, %c0_186, %c15_187, %c0_188] : memref<2x4x16x16xf32, #tpu.memory_space<vmem>>, vector<2x4x1x16xf32>
    %92 = vector.shape_cast %91 : vector<2x4x1x16xf32> to vector<2x4x16xf32>
    %c0_189 = arith.constant 0 : index
    %c0_190 = arith.constant 0 : index
    %c272 = arith.constant 272 : index
    %93 = vector.load %arg10[%c0_189, %c0_190, %c272] : memref<2x12x289xf32, #tpu.memory_space<vmem>>, vector<2x4x16xf32>
    tpu.vector_store %arg10[%c0_189, %c0_190, %c272], %92 {strides = array<i32>} : memref<2x12x289xf32, #tpu.memory_space<vmem>>, vector<2x4x16xf32>,
    %c0_191 = arith.constant 0 : index
    %c4_192 = arith.constant 4 : index
    %c256_193 = arith.constant 256 : index
    %94 = vector.load %arg10[%c0_191, %c4_192, %c256_193] : memref<2x12x289xf32, #tpu.memory_space<vmem>>, vector<2x4x16xf32>
    tpu.vector_store %arg10[%c0_191, %c4_192, %c256_193], %92 {strides = array<i32>} : memref<2x12x289xf32, #tpu.memory_space<vmem>>, vector<2x4x16xf32>,
    %c0_194 = arith.constant 0 : index
    %c8_195 = arith.constant 8 : index
    %c240_196 = arith.constant 240 : index
    %95 = vector.load %arg10[%c0_194, %c8_195, %c240_196] : memref<2x12x289xf32, #tpu.memory_space<vmem>>, vector<2x4x16xf32>
    tpu.vector_store %arg10[%c0_194, %c8_195, %c240_196], %92 {strides = array<i32>} : memref<2x12x289xf32, #tpu.memory_space<vmem>>, vector<2x4x16xf32>,
    %96 = tpu.iota {dimensions = array<i32: 1>} : vector<1x256xi32>
    %c16_i32 = arith.constant 16 : i32
    %c0_i32 = arith.constant 0 : i32
    %97 = arith.cmpi eq, %c16_i32, %c0_i32 : i32
    %c1_i32 = arith.constant 1 : i32
    %98 = arith.select %97, %c1_i32, %c16_i32 : i32
    %99 = vector.broadcast %98 : i32 to vector<1x256xi32>
    %100 = arith.remsi %96, %99 : vector<1x256xi32>
    %c0_i32_197 = arith.constant 0 : i32
    %101 = vector.broadcast %c0_i32_197 : i32 to vector<1x256xi32>
    %102 = arith.cmpi ne, %100, %101 : vector<1x256xi32>
    %c0_i32_198 = arith.constant 0 : i32
    %103 = vector.broadcast %c0_i32_198 : i32 to vector<1x256xi32>
    %104 = arith.cmpi slt, %100, %103 : vector<1x256xi32>
    %c0_i32_199 = arith.constant 0 : i32
    %105 = arith.cmpi slt, %98, %c0_i32_199 : i32
    %106 = vector.broadcast %105 : i1 to vector<1x256xi1>
    %107 = vector.broadcast %106 : vector<1x256xi1> to vector<1x256xi1>
    %108 = arith.xori %104, %107 : vector<1x256xi1>
    %109 = arith.andi %108, %102 : vector<1x256xi1>
    %110 = vector.broadcast %98 : i32 to vector<1x256xi32>
    %111 = arith.addi %100, %110 : vector<1x256xi32>
    %112 = arith.select %109, %111, %100 : vector<1x256xi1>, vector<1x256xi32>
    %c0_i32_200 = arith.constant 0 : i32
    %113 = vector.broadcast %c0_i32_200 : i32 to vector<1x256xi32>
    %114 = arith.cmpi sgt, %112, %113 : vector<1x256xi32>
    %c15_i32 = arith.constant 15 : i32
    %115 = vector.broadcast %c15_i32 : i32 to vector<1x256xi32>
    %116 = arith.cmpi slt, %112, %115 : vector<1x256xi32>
    %c0_201 = arith.constant 0 : index
    %c0_202 = arith.constant 0 : index
    %117 = vector.load %arg6[%c0_201, %c0_202] : memref<4x1xf32, #tpu.memory_space<vmem>>, vector<4x1xf32>
    %c0_203 = arith.constant 0 : index
    %c0_204 = arith.constant 0 : index
    %118 = vector.load %arg7[%c0_203, %c0_204] : memref<4x1xf32, #tpu.memory_space<vmem>>, vector<4x1xf32>
    %c0_205 = arith.constant 0 : index
    %c0_206 = arith.constant 0 : index
    %c15_207 = arith.constant 15 : index
    %119 = vector.load %arg10[%c0_205, %c0_206, %c15_207] : memref<2x12x289xf32, #tpu.memory_space<vmem>>, vector<1x12x256xf32>
    %120 = vector.shape_cast %119 : vector<1x12x256xf32> to vector<12x256xf32>
    %c0_208 = arith.constant 0 : index
    %c0_209 = arith.constant 0 : index
    %c0_210 = arith.constant 0 : index
    %121 = vector.load %arg5[%c0_208, %c0_209, %c0_210] : memref<3x4x12xf32, #tpu.memory_space<vmem>>, vector<1x4x12xf32>
    %122 = vector.shape_cast %121 : vector<1x4x12xf32> to vector<4x12xf32>
    %cst_211 = arith.constant dense<0.000000e+00> : vector<4x256xf32>
    %123 = tpu.matmul %122, %120, %cst_211 {dimension_numbers = #tpu.dot_dimension_numbers<[1], [0], [0], [1], [0, 0, 1, 1], [], []>} : vector<4x12xf32>, vector<12x256xf32>, vector<4x256xf32> -> vector<4x256xf32>
    %cst_212 = arith.constant 0.000000e+00 : f32
    %124 = vector.shape_cast %114 : vector<1x256xi1> to vector<1x256xi1>
    %125 = vector.broadcast %124 : vector<1x256xi1> to vector<4x256xi1>
    %126 = vector.broadcast %cst_212 : f32 to vector<4x256xf32>
    %127 = arith.select %125, %123, %126 : vector<4x256xi1>, vector<4x256xf32>
    %c0_213 = arith.constant 0 : index
    %c0_214 = arith.constant 0 : index
    %c16_215 = arith.constant 16 : index
    %128 = vector.load %arg10[%c0_213, %c0_214, %c16_215] : memref<2x12x289xf32, #tpu.memory_space<vmem>>, vector<1x12x256xf32>
    %129 = vector.shape_cast %128 : vector<1x12x256xf32> to vector<12x256xf32>
    %c1_216 = arith.constant 1 : index
    %c0_217 = arith.constant 0 : index
    %c0_218 = arith.constant 0 : index
    %130 = vector.load %arg5[%c1_216, %c0_217, %c0_218] : memref<3x4x12xf32, #tpu.memory_space<vmem>>, vector<1x4x12xf32>
    %131 = vector.shape_cast %130 : vector<1x4x12xf32> to vector<4x12xf32>
    %cst_219 = arith.constant dense<0.000000e+00> : vector<4x256xf32>
    %132 = tpu.matmul %131, %129, %cst_219 {dimension_numbers = #tpu.dot_dimension_numbers<[1], [0], [0], [1], [0, 0, 1, 1], [], []>} : vector<4x12xf32>, vector<12x256xf32>, vector<4x256xf32> -> vector<4x256xf32>
    %133 = arith.addf %127, %132 : vector<4x256xf32>
    %c0_220 = arith.constant 0 : index
    %c0_221 = arith.constant 0 : index
    %c17 = arith.constant 17 : index
    %134 = vector.load %arg10[%c0_220, %c0_221, %c17] : memref<2x12x289xf32, #tpu.memory_space<vmem>>, vector<1x12x256xf32>
    %135 = vector.shape_cast %134 : vector<1x12x256xf32> to vector<12x256xf32>
    %c2_222 = arith.constant 2 : index
    %c0_223 = arith.constant 0 : index
    %c0_224 = arith.constant 0 : index
    %136 = vector.load %arg5[%c2_222, %c0_223, %c0_224] : memref<3x4x12xf32, #tpu.memory_space<vmem>>, vector<1x4x12xf32>
    %137 = vector.shape_cast %136 : vector<1x4x12xf32> to vector<4x12xf32>
    %cst_225 = arith.constant dense<0.000000e+00> : vector<4x256xf32>
    %138 = tpu.matmul %137, %135, %cst_225 {dimension_numbers = #tpu.dot_dimension_numbers<[1], [0], [0], [1], [0, 0, 1, 1], [], []>} : vector<4x12xf32>, vector<12x256xf32>, vector<4x256xf32> -> vector<4x256xf32>
    %cst_226 = arith.constant 0.000000e+00 : f32
    %139 = vector.shape_cast %116 : vector<1x256xi1> to vector<1x256xi1>
    %140 = vector.broadcast %139 : vector<1x256xi1> to vector<4x256xi1>
    %141 = vector.broadcast %cst_226 : f32 to vector<4x256xf32>
    %142 = arith.select %140, %138, %141 : vector<4x256xi1>, vector<4x256xf32>
    %143 = arith.addf %133, %142 : vector<4x256xf32>
    %144 = vector.broadcast %117 : vector<4x1xf32> to vector<4x256xf32>
    %145 = arith.mulf %143, %144 : vector<4x256xf32>
    %146 = vector.broadcast %118 : vector<4x1xf32> to vector<4x256xf32>
    %147 = arith.addf %145, %146 : vector<4x256xf32>
    %cst_227 = arith.constant 0.000000e+00 : f32
    %148 = vector.broadcast %cst_227 : f32 to vector<4x256xf32>
    %149 = arith.maximumf %147, %148 : vector<4x256xf32>
    %c0_228 = arith.constant 0 : index
    %c0_229 = arith.constant 0 : index
    %c0_230 = arith.constant 0 : index
    %150 = vector.load %arg8[%c0_228, %c0_229, %c0_230] : memref<2x4x256xf32, #tpu.memory_space<vmem>>, vector<1x4x256xf32>
    %151 = vector.shape_cast %150 : vector<1x4x256xf32> to vector<4x256xf32>
    %152 = vector.shape_cast %149 : vector<4x256xf32> to vector<1x4x256xf32>
    tpu.vector_store %arg8[%c0_228, %c0_229, %c0_230], %152 {strides = array<i32>} : memref<2x4x256xf32, #tpu.memory_space<vmem>>, vector<1x4x256xf32>,
    %c1_231 = arith.constant 1 : index
    %c0_232 = arith.constant 0 : index
    %c15_233 = arith.constant 15 : index
    %153 = vector.load %arg10[%c1_231, %c0_232, %c15_233] : memref<2x12x289xf32, #tpu.memory_space<vmem>>, vector<1x12x256xf32>
    %154 = vector.shape_cast %153 : vector<1x12x256xf32> to vector<12x256xf32>
    %c0_234 = arith.constant 0 : index
    %c0_235 = arith.constant 0 : index
    %c0_236 = arith.constant 0 : index
    %155 = vector.load %arg5[%c0_234, %c0_235, %c0_236] : memref<3x4x12xf32, #tpu.memory_space<vmem>>, vector<1x4x12xf32>
    %156 = vector.shape_cast %155 : vector<1x4x12xf32> to vector<4x12xf32>
    %cst_237 = arith.constant dense<0.000000e+00> : vector<4x256xf32>
    %157 = tpu.matmul %156, %154, %cst_237 {dimension_numbers = #tpu.dot_dimension_numbers<[1], [0], [0], [1], [0, 0, 1, 1], [], []>} : vector<4x12xf32>, vector<12x256xf32>, vector<4x256xf32> -> vector<4x256xf32>
    %cst_238 = arith.constant 0.000000e+00 : f32
    %158 = vector.shape_cast %114 : vector<1x256xi1> to vector<1x256xi1>
    %159 = vector.broadcast %158 : vector<1x256xi1> to vector<4x256xi1>
    %160 = vector.broadcast %cst_238 : f32 to vector<4x256xf32>
    %161 = arith.select %159, %157, %160 : vector<4x256xi1>, vector<4x256xf32>
    %c1_239 = arith.constant 1 : index
    %c0_240 = arith.constant 0 : index
    %c16_241 = arith.constant 16 : index
    %162 = vector.load %arg10[%c1_239, %c0_240, %c16_241] : memref<2x12x289xf32, #tpu.memory_space<vmem>>, vector<1x12x256xf32>
    %163 = vector.shape_cast %162 : vector<1x12x256xf32> to vector<12x256xf32>
    %c1_242 = arith.constant 1 : index
    %c0_243 = arith.constant 0 : index
    %c0_244 = arith.constant 0 : index
    %164 = vector.load %arg5[%c1_242, %c0_243, %c0_244] : memref<3x4x12xf32, #tpu.memory_space<vmem>>, vector<1x4x12xf32>
    %165 = vector.shape_cast %164 : vector<1x4x12xf32> to vector<4x12xf32>
    %cst_245 = arith.constant dense<0.000000e+00> : vector<4x256xf32>
    %166 = tpu.matmul %165, %163, %cst_245 {dimension_numbers = #tpu.dot_dimension_numbers<[1], [0], [0], [1], [0, 0, 1, 1], [], []>} : vector<4x12xf32>, vector<12x256xf32>, vector<4x256xf32> -> vector<4x256xf32>
    %167 = arith.addf %161, %166 : vector<4x256xf32>
    %c1_246 = arith.constant 1 : index
    %c0_247 = arith.constant 0 : index
    %c17_248 = arith.constant 17 : index
    %168 = vector.load %arg10[%c1_246, %c0_247, %c17_248] : memref<2x12x289xf32, #tpu.memory_space<vmem>>, vector<1x12x256xf32>
    %169 = vector.shape_cast %168 : vector<1x12x256xf32> to vector<12x256xf32>
    %c2_249 = arith.constant 2 : index
    %c0_250 = arith.constant 0 : index
    %c0_251 = arith.constant 0 : index
    %170 = vector.load %arg5[%c2_249, %c0_250, %c0_251] : memref<3x4x12xf32, #tpu.memory_space<vmem>>, vector<1x4x12xf32>
    %171 = vector.shape_cast %170 : vector<1x4x12xf32> to vector<4x12xf32>
    %cst_252 = arith.constant dense<0.000000e+00> : vector<4x256xf32>
    %172 = tpu.matmul %171, %169, %cst_252 {dimension_numbers = #tpu.dot_dimension_numbers<[1], [0], [0], [1], [0, 0, 1, 1], [], []>} : vector<4x12xf32>, vector<12x256xf32>, vector<4x256xf32> -> vector<4x256xf32>
    %cst_253 = arith.constant 0.000000e+00 : f32
    %173 = vector.shape_cast %116 : vector<1x256xi1> to vector<1x256xi1>
    %174 = vector.broadcast %173 : vector<1x256xi1> to vector<4x256xi1>
    %175 = vector.broadcast %cst_253 : f32 to vector<4x256xf32>
    %176 = arith.select %174, %172, %175 : vector<4x256xi1>, vector<4x256xf32>
    %177 = arith.addf %167, %176 : vector<4x256xf32>
    %178 = vector.broadcast %117 : vector<4x1xf32> to vector<4x256xf32>
    %179 = arith.mulf %177, %178 : vector<4x256xf32>
    %180 = vector.broadcast %118 : vector<4x1xf32> to vector<4x256xf32>
    %181 = arith.addf %179, %180 : vector<4x256xf32>
    %cst_254 = arith.constant 0.000000e+00 : f32
    %182 = vector.broadcast %cst_254 : f32 to vector<4x256xf32>
    %183 = arith.maximumf %181, %182 : vector<4x256xf32>
    %c1_255 = arith.constant 1 : index
    %c0_256 = arith.constant 0 : index
    %c0_257 = arith.constant 0 : index
    %184 = vector.load %arg8[%c1_255, %c0_256, %c0_257] : memref<2x4x256xf32, #tpu.memory_space<vmem>>, vector<1x4x256xf32>
    %185 = vector.shape_cast %184 : vector<1x4x256xf32> to vector<4x256xf32>
    %186 = vector.shape_cast %183 : vector<4x256xf32> to vector<1x4x256xf32>
    tpu.vector_store %arg8[%c1_255, %c0_256, %c0_257], %186 {strides = array<i32>} : memref<2x4x256xf32, #tpu.memory_space<vmem>>, vector<1x4x256xf32>,
    return
  }
  func.func @transform_0(%arg0: i32) -> (i32, i32, i32) {
    %c0_i32 = arith.constant 0 : i32
    %c0_i32_0 = arith.constant 0 : i32
    %c0_i32_1 = arith.constant 0 : i32
    return %arg0, %c0_i32, %c0_i32_0 : i32, i32, i32
  }
  func.func @transform_1(%arg0: i32) -> (i32, i32, i32) {
    %c0_i32 = arith.constant 0 : i32
    %c0_i32_0 = arith.constant 0 : i32
    %c0_i32_1 = arith.constant 0 : i32
    return %arg0, %c0_i32, %c0_i32_0 : i32, i32, i32
  }
  func.func @transform_2(%arg0: i32) -> (i32, i32) {
    %c0_i32 = arith.constant 0 : i32
    %c0_i32_0 = arith.constant 0 : i32
    %c0_i32_1 = arith.constant 0 : i32
    return %c0_i32, %c0_i32_0 : i32, i32
  }
  func.func @transform_3(%arg0: i32) -> (i32, i32) {
    %c0_i32 = arith.constant 0 : i32
    %c0_i32_0 = arith.constant 0 : i32
    %c0_i32_1 = arith.constant 0 : i32
    return %c0_i32, %c0_i32_0 : i32, i32
  }
  func.func @transform_4(%arg0: i32) -> (i32, i32, i32) {
    %c0_i32 = arith.constant 0 : i32
    %c0_i32_0 = arith.constant 0 : i32
    %c0_i32_1 = arith.constant 0 : i32
    %c0_i32_2 = arith.constant 0 : i32
    return %c0_i32, %c0_i32_0, %c0_i32_1 : i32, i32, i32
  }
  func.func @transform_5(%arg0: i32) -> (i32, i32) {
    %c0_i32 = arith.constant 0 : i32
    %c0_i32_0 = arith.constant 0 : i32
    %c0_i32_1 = arith.constant 0 : i32
    return %c0_i32, %c0_i32_0 : i32, i32
  }
  func.func @transform_6(%arg0: i32) -> (i32, i32) {
    %c0_i32 = arith.constant 0 : i32
    %c0_i32_0 = arith.constant 0 : i32
    %c0_i32_1 = arith.constant 0 : i32
    return %c0_i32, %c0_i32_0 : i32, i32
  }
  func.func @transform_7(%arg0: i32) -> (i32, i32, i32) {
    %c0_i32 = arith.constant 0 : i32
    %c0_i32_0 = arith.constant 0 : i32
    %c0_i32_1 = arith.constant 0 : i32
    return %arg0, %c0_i32, %c0_i32_0 : i32, i32, i32
  }
}

</mosaic_0001>

<bundles_post_ra>
// kernel: tpu_custom_call.1
= control target key start
LH: loop header
LB: loop body
LE: loop exit
PB: predicated region body
PF: predicated region fallthrough
CT: control target
= control target key end

     0   :  { %12 = vsyncpa [#allocation5], 0  ;;  %s4517_s0 = inlined_call_operand.hbm [shape: f32[8,8,8], index: 0, kind: input, shape index: {}]   ;;  %s4518_s1 = inlined_call_operand.hbm [shape: f32[8,16,16], index: 1, kind: input, shape index: {}]   ;;  %s4519_s2 = inlined_call_operand.vmem [shape: f32[16,8], index: 2, kind: input, shape index: {}]   ;;  %s4520_s3 = inlined_call_operand.vmem [shape: f32[8,16], index: 3, kind: input, shape index: {}]   ;;  %s4521_s4 = inlined_call_operand.vmem [shape: f32[3,4,12], index: 4, kind: input, shape index: {}]   ;;  %s4522_s5 = inlined_call_operand.vmem [shape: f32[4,1], index: 5, kind: input, shape index: {}]   ;;  %s4523_s6 = inlined_call_operand.vmem [shape: f32[4,1], index: 6, kind: input, shape index: {}]   ;;  %s4524_s7 = inlined_call_operand.hbm [shape: f32[2,4,256], index: 7, kind: output, shape index: {}]  }
   0x1   :  { %13 = vsyncpa [#allocation8], 0 }
   0x2   :  { %14 = vsyncpa [#allocation6], 0  ;;  %s3478_s24 = smov [#allocation4]   ;;  %s3406_s28 = scalar_lea.hbm %s4517_s0, 1024 }
   0x3   :  { %s20_s25 = sshll.u32 %s3478_s24, 4  ;;  %p3407_p0 = scmp.ne.s32.totalorder %s4517_s0, %s3406_s28  ;;  %s21_s25 = int_to_ptr.vmem [resolvable:$true] %s20_s25 }
   0x4   :  { %p3410_p1 = scmp.lt.u32.totalorder %s3406_s28, %s4517_s0 }
   0x6   :  { %p3412_p2 = pnand %p3410_p1, %p3407_p0 }
   0x8   :  { %3415 = shalt.err (!%p3412_p2)
}
   0x9   :  { %s3416_s10 = scalar_lea.vmem %s21_s25, 1024  ;;  %p3421_p4 = scmp.lt.s32.totalorder %s21_s25, %s21_s25 }
   0xa   :  { %p3417_p3 = scmp.ne.s32.totalorder %s21_s25, %s3416_s10  ;;  %p3422_p5 = scmp.lt.s32.totalorder %s3416_s10, %s3416_s10 }
   0xc   :  { %p3423_p6 = por %p3422_p5, %p3421_p4 }
   0xe   :  { %p3424_p7 = pnand %p3423_p6, %p3417_p3 }
  0x10   :  { %3427 = shalt.err (!%p3424_p7)
}
  0x11   :  { %s3479_s11 = smov 128   ;;  %s3480_s12 = smov 8  }
  0x12   :  { %26 = dma.hbm_to_vmem [thread:$0]  %s4517_s0, 1024, %s21_s25, [#allocation5], %s3479_s11, %s3479_s11, %s3480_s12  }
  0x13   :  { %s3481_s15 = smov [#allocation7]   ;;  %s3428_s19 = scalar_lea.hbm %s4518_s1, 2048 }
  0x14   :  { %s32_s16 = sshll.u32 %s3481_s15, 4  ;;  %p3429_p8 = scmp.ne.s32.totalorder %s4518_s1, %s3428_s19  ;;  %s33_s16 = int_to_ptr.vmem [resolvable:$true] %s32_s16 }
  0x15   :  { %p3432_p9 = scmp.lt.u32.totalorder %s3428_s19, %s4518_s1 }
  0x17   :  { %p3434_p10 = pnand %p3432_p9, %p3429_p8 }
  0x19   :  { %3437 = shalt.err (!%p3434_p10)
}
  0x1a   :  { %s3438_s24 = scalar_lea.vmem %s33_s16, 2048  ;;  %p3443_p12 = scmp.lt.s32.totalorder %s33_s16, %s33_s16 }
  0x1b   :  { %p3439_p11 = scmp.ne.s32.totalorder %s33_s16, %s3438_s24  ;;  %p3444_p13 = scmp.lt.s32.totalorder %s3438_s24, %s3438_s24 }
  0x1d   :  { %p3445_p0 = por %p3444_p13, %p3443_p12 }
  0x1f   :  { %p3446_p1 = pnand %p3445_p0, %p3439_p11 }
  0x21   :  { %3449 = shalt.err (!%p3446_p1)
}
  0x22   :  { %38 = dma.hbm_to_vmem [thread:$0]  %s4518_s1, 2048, %s33_s16, [#allocation8], %s3479_s11, %s3479_s11, %s3480_s12  }
  0x23   :  { %3472 = dma.done.wait [#allocation5], 1024  }
  0x24   :  { %3473 = vsyncadd [#allocation5], 4294966272 }
  0x25   :  { %3474 = dma.done.wait [#allocation8], 2048  }
  0x26   :  { %3475 = vsyncadd [#allocation8], 4294965248  ;;  %v3482_v0 = vmov 0.0   ;;  %vm3483_vm0 = vmmov 0   ;;  %vm64_vm1 = vcmask 64512   ;;  %v63_v1 = vld [vmem:[%s4520_s3] sm:$0xff] }
  0x27   :  { %3180 = vmatprep.subr.mxu0 %v3482_v0  ;;  %3185 = vmatprep.subr.mxu1 %v3482_v0  ;;  %v55_v2 = vld [vmem:[#allocation4] sm:$0xff]  ;;  %v56_v3 = vld [vmem:[#allocation4 + $0x8] sm:$0xff]  ;;  %v57_v4 = vld [vmem:[#allocation4 + $0x10] sm:$0xff]  ;;  %vm1312_vm2 = vcmask 138240   ;;  %vm1308_vm3 = vcmask 257144   ;;  %vm1289_vm4 = vcmask 130048  }
  0x28   :  { %3182 = vmatprep.mubr.msk.f32.mxu0 %vm3483_vm0, %v3482_v0  ;;  %3187 = vmatprep.mubr.msk.f32.mxu1 %vm3483_vm0, %v3482_v0  ;;  %v58_v5 = vld [vmem:[#allocation4 + $0x18] sm:$0xff]  ;;  %v59_v6 = vld [vmem:[#allocation4 + $0x20] sm:$0xff]  ;;  %v60_v7 = vld [vmem:[#allocation4 + $0x28] sm:$0xff]  ;;  %1313 = vst.msk [vmem:[#allocation3 + $0x10] sm:$0xff] %vm1312_vm2, %v3482_v0  ;;  %vm1335_vm5 = vcmask 1041409   ;;  %vm1338_vm6 = vcmask 1042434  }
  0x29   :  { %3181 = vmatpush3.msra.mxu0 %v63_v1  ;;  %3186 = vmatpush3.msra.mxu1 %v63_v1  ;;  %v61_v8 = vld [vmem:[#allocation4 + $0x30] sm:$0xff]  ;;  %v62_v9 = vld [vmem:[#allocation4 + $0x38] sm:$0xff]  ;;  %v649_v10 = vld [vmem:[%s4519_s2] sm:$0xff]  ;;  %1316 = vst.msk [vmem:[#allocation3 + $0x40] sm:$0xff] %vm1312_vm2, %v3482_v0  ;;  %vm1341_vm7 = vcmask 1043459   ;;  %vm1360_vm8 = vcmask 1045509  }
  0x2a   :  { %3183 = vmatmul.mubr.msk.f32.vlgmr.msra.gmra.mrb[0].mxu0 %vm64_vm1, %v55_v2  ;;  %3188 = vmatmul.mubr.msk.f32.vlgmr.msra.gmra.mrb[0].mxu1 %vm64_vm1, %v56_v3  ;;  %v650_v13 = vld [vmem:[%s4519_s2 + $0x8] sm:$0xff]  ;;  %1309 = vst.msk [vmem:[#allocation3 + $0x18] sm:$0xf] %vm1308_vm3, %v3482_v0  ;;  %1311 = vst.msk [vmem:[#allocation3 + $0x48] sm:$0xf] %vm1308_vm3, %v3482_v0  ;;  %v1260_v28 = vld [vmem:[#allocation7 + $0x18] sm:$0xff] }
  0x2b   :  { %3190 = vmatprep.subr.mxu0 %v3482_v0  ;;  %3195 = vmatprep.subr.mxu1 %v3482_v0  ;;  %v1258_v29 = vld [vmem:[#allocation7 + $0x8] sm:$0xff]  ;;  %v1259_v30 = vld [vmem:[#allocation7 + $0x10] sm:$0xff]  ;;  %v1257_v31 = vld [vmem:[#allocation7] sm:$0xff]  ;;  %vm1363_vm9 = vcmask 1046534   ;;  %vm1366_vm10 = vcmask 1047559   ;;  %vm1386_vm11 = vcmask 125952  }
  0x2c   :  { %3191 = vmatpush3.msra.mxu0 %v63_v1  ;;  %3192 = vmatprep.mubr.msk.f32.mxu0 %vm3483_vm0, %v3482_v0  ;;  %v1262_v40 = vld [vmem:[#allocation7 + $0x28] sm:$0xff]  ;;  %v1264_v41 = vld [vmem:[#allocation7 + $0x38] sm:$0xff]  ;;  %v1261_v42 = vld [vmem:[#allocation7 + $0x20] sm:$0xff]  ;;  %s3484_s2 = smov 16   ;;  %s3485_s30 = smov 32   ;;  %vm1845_vm12 = vcmask 130052  }
  0x2d   :  { %3196 = vmatpush3.msra.mxu1 %v63_v1  ;;  %3197 = vmatprep.mubr.msk.f32.mxu1 %vm3483_vm0, %v3482_v0  ;;  %v1263_v43 = vld [vmem:[#allocation7 + $0x30] sm:$0xff]  ;;  %v1266_v52 = vld [vmem:[#allocation7 + $0x48] sm:$0xff]  ;;  %v1268_v53 = vld [vmem:[#allocation7 + $0x58] sm:$0xff]  ;;  %s3486_s8 = smov 48   ;;  %s3487_s9 = smov 64   ;;  %vm1306_vm13 = vcmask 261240  }
  0x2e   :  { %3193 = vmatmul.mubr.msk.f32.vlgmr.msra.gmra.mrb[2].mxu0 %vm64_vm1, %v57_v4  ;;  %3198 = vmatmul.mubr.msk.f32.vlgmr.msra.gmra.mrb[2].mxu1 %vm64_vm1, %v58_v5  ;;  %v1265_v54 = vld [vmem:[#allocation7 + $0x40] sm:$0xff]  ;;  %v1267_v55 = vld [vmem:[#allocation7 + $0x50] sm:$0xff]  ;;  %s3488_s10 = smov 80   ;;  %s3489_s13 = smov 96   ;;  %1307 = vst.msk [vmem:[#allocation3] sm:$0xff] %vm1306_vm13, %v3482_v0  ;;  %1310 = vst.msk [vmem:[#allocation3 + $0x30] sm:$0xff] %vm1306_vm13, %v3482_v0 }
  0x2f   :  { %3200 = vmatprep.subr.mxu0 %v3482_v0  ;;  %3202 = vmatprep.mubr.msk.f32.mxu0 %vm3483_vm0, %v3482_v0  ;;  %s3490_s14 = smov 112   ;;  %vm1314_vm14 = vcmask 134144   ;;  %vm1455_vm15 = vcmask 257152   ;;  %vm4527_vm2 = vcmask 523652   ;;  %vm1355_vm3 = vcmask 388352   ;;  %s3491_s15 = smov 113  }
  0x30   :  { %3201 = vmatpush3.msra.mxu0 %v63_v1  ;;  %3205 = vmatprep.subr.mxu1 %v3482_v0  ;;  %1315 = vst.msk [vmem:[#allocation3 + $0x28] sm:$0xf] %vm1314_vm14, %v3482_v0  ;;  %1317 = vst.msk [vmem:[#allocation3 + $0x58] sm:$0xf] %vm1314_vm14, %v3482_v0  ;;  %vm1492_vm13 = vcmask 650752   ;;  %vm1560_vm14 = vcmask 781952  }
  0x31   :  { %3206 = vmatpush3.msra.mxu1 %v63_v1  ;;  %3207 = vmatprep.mubr.msk.f32.mxu1 %vm3483_vm0, %v3482_v0  ;;  %s3492_s16 = smov 111  }
  0x32   :  { %3203 = vmatmul.mubr.msk.f32.vlgmr.msra.gmra.mrb[4].mxu0 %vm64_vm1, %v59_v6  ;;  %3208 = vmatmul.mubr.msk.f32.vlgmr.msra.gmra.mrb[4].mxu1 %vm64_vm1, %v60_v7 }
  0x33   :  { %3210 = vmatprep.subr.mxu0 %v3482_v0  ;;  %3212 = vmatprep.mubr.msk.f32.mxu0 %vm3483_vm0, %v3482_v0 }
  0x34   :  { %3211 = vmatpush3.msra.mxu0 %v63_v1  ;;  %3215 = vmatprep.subr.mxu1 %v3482_v0 }
  0x35   :  { %3216 = vmatpush3.msra.mxu1 %v63_v1  ;;  %3217 = vmatprep.mubr.msk.f32.mxu1 %vm3483_vm0, %v3482_v0  ;;  %vm1381_vm0 = vcmask 261252  }
  0x36   :  { %3213 = vmatmul.mubr.msk.f32.vlgmr.msra.gmra.mrb[6].mxu0 %vm64_vm1, %v61_v8  ;;  %3218 = vmatmul.mubr.msk.f32.vlgmr.msra.gmra.mrb[6].mxu1 %vm64_vm1, %v62_v9 }
  0x37   :  { %3222 = vmatprep.mubr.msk.f32.mxu0 %vm64_vm1, %v649_v10  ;;  %3227 = vmatprep.mubr.msk.f32.mxu1 %vm64_vm1, %v649_v10 }
  0xfd   :  { %v134_v11 = vpop.f32.mrb[0].mxu0  ;;  %v207_v12 = vpop.f32.mrb[0].mxu1 }
  0xfe   :  { %v3184_v14 = vpop.f32.mrb[1].mxu0  ;;  %v3189_v15 = vpop.f32.mrb[1].mxu1  ;;  %3220 = vmatprep.subr.mxu0 %v134_v11  ;;  %3225 = vmatprep.subr.mxu1 %v207_v12 }
  0xff   :  { %3221 = vmatpush3.msra.mxu0 %v134_v11  ;;  %3226 = vmatpush3.msra.mxu1 %v207_v12 }
 0x100   :  { %3223 = vmatmul.mubr.msk.f32.vlgmr.msra.gmra.mrb[8].mxu0 %vm64_vm1, %v650_v13  ;;  %3228 = vmatmul.mubr.msk.f32.vlgmr.msra.gmra.mrb[8].mxu1 %vm64_vm1, %v650_v13 }
 0x101   :  { %v280_v16 = vpop.f32.mrb[2].mxu0  ;;  %v353_v17 = vpop.f32.mrb[2].mxu1  ;;  %3232 = vmatprep.mubr.msk.f32.mxu0 %vm64_vm1, %v649_v10  ;;  %3237 = vmatprep.mubr.msk.f32.mxu1 %vm64_vm1, %v649_v10 }
 0x102   :  { %v3194_v18 = vpop.f32.mrb[3].mxu0  ;;  %v3199_v19 = vpop.f32.mrb[3].mxu1  ;;  %3230 = vmatprep.subr.mxu0 %v280_v16  ;;  %3235 = vmatprep.subr.mxu1 %v353_v17 }
 0x103   :  { %3231 = vmatpush3.msra.mxu0 %v280_v16  ;;  %3236 = vmatpush3.msra.mxu1 %v353_v17 }
 0x104   :  { %3233 = vmatmul.mubr.msk.f32.vlgmr.msra.gmra.mrb[10].mxu0 %vm64_vm1, %v650_v13  ;;  %3238 = vmatmul.mubr.msk.f32.vlgmr.msra.gmra.mrb[10].mxu1 %vm64_vm1, %v650_v13 }
 0x105   :  { %v426_v20 = vpop.f32.mrb[4].mxu0  ;;  %v499_v21 = vpop.f32.mrb[4].mxu1  ;;  %3242 = vmatprep.mubr.msk.f32.mxu0 %vm64_vm1, %v649_v10  ;;  %3247 = vmatprep.mubr.msk.f32.mxu1 %vm64_vm1, %v649_v10 }
 0x106   :  { %3240 = vmatprep.subr.mxu0 %v426_v20  ;;  %3245 = vmatprep.subr.mxu1 %v499_v21  ;;  %v3204_v22 = vpop.f32.mrb[5].mxu0  ;;  %v3209_v23 = vpop.f32.mrb[5].mxu1 }
 0x107   :  { %3241 = vmatpush3.msra.mxu0 %v426_v20  ;;  %3246 = vmatpush3.msra.mxu1 %v499_v21 }
 0x108   :  { %3243 = vmatmul.mubr.msk.f32.vlgmr.msra.gmra.mrb[12].mxu0 %vm64_vm1, %v650_v13  ;;  %3248 = vmatmul.mubr.msk.f32.vlgmr.msra.gmra.mrb[12].mxu1 %vm64_vm1, %v650_v13 }
 0x109   :  { %v572_v24 = vpop.f32.mrb[6].mxu0  ;;  %v645_v25 = vpop.f32.mrb[6].mxu1  ;;  %3252 = vmatprep.mubr.msk.f32.mxu0 %vm64_vm1, %v649_v10  ;;  %3257 = vmatprep.mubr.msk.f32.mxu1 %vm64_vm1, %v649_v10 }
 0x10a   :  { %3250 = vmatprep.subr.mxu0 %v572_v24  ;;  %3255 = vmatprep.subr.mxu1 %v645_v25  ;;  %v3214_v26 = vpop.f32.mrb[7].mxu0  ;;  %v3219_v27 = vpop.f32.mrb[7].mxu1 }
 0x10b   :  { %3251 = vmatpush3.msra.mxu0 %v572_v24  ;;  %3256 = vmatpush3.msra.mxu1 %v645_v25 }
 0x10c   :  { %3253 = vmatmul.mubr.msk.f32.vlgmr.msra.gmra.mrb[14].mxu0 %vm64_vm1, %v650_v13  ;;  %3258 = vmatmul.mubr.msk.f32.vlgmr.msra.gmra.mrb[14].mxu1 %vm64_vm1, %v650_v13  ;;  %vm1446_vm1 = vcmask 392452  }
 0x10d   :  { %2510 = vmatprep.mubr.f32.mxu0 %v3482_v0  ;;  %2615 = vmatprep.mubr.f32.mxu1 %v3482_v0 }
 0x1d3   :  { %v3229_v32 = vpop.f32.mrb[8].mxu1  ;;  %v3224_v33 = vpop.f32.mrb[8].mxu0 }
 0x1d4   :  { %v1276_v34 = vadd.f32 %v3229_v32, %v1260_v28  ;;  %v1274_v35 = vadd.f32 %v3224_v33, %v1258_v29  ;;  %v798_v36 = vpop.f32.mrb[9].mxu1  ;;  %v723_v37 = vpop.f32.mrb[9].mxu0 }
 0x1d5   :  { %v1275_v38 = vadd.f32 %v1259_v30, %v798_v36  ;;  %v1273_v39 = vadd.f32 %v1257_v31, %v723_v37 }
 0x1d6   :  { %1293 = vst.msk [vmem:[#allocation2 + $0x18] sm:$0xff] %vm1289_vm4, %v1276_v34  ;;  %1291 = vst.msk [vmem:[#allocation2 + $0x8] sm:$0xff] %vm1289_vm4, %v1274_v35 }
 0x1d7   :  { %1292 = vst.msk [vmem:[#allocation2 + $0x10] sm:$0xff] %vm1289_vm4, %v1275_v38  ;;  %1290 = vst.msk [vmem:[#allocation2] sm:$0xff] %vm1289_vm4, %v1273_v39  ;;  %v3234_v44 = vpop.f32.mrb[10].mxu0  ;;  %v3239_v45 = vpop.f32.mrb[10].mxu1 }
 0x1d8   :  { %v1278_v46 = vadd.f32 %v3234_v44, %v1262_v40  ;;  %v873_v47 = vpop.f32.mrb[11].mxu0  ;;  %v1280_v48 = vadd.f32 %v3239_v45, %v1264_v41  ;;  %v948_v49 = vpop.f32.mrb[11].mxu1 }
 0x1d9   :  { %v1277_v50 = vadd.f32 %v1261_v42, %v873_v47  ;;  %v1279_v51 = vadd.f32 %v1263_v43, %v948_v49 }
 0x1da   :  { %1295 = vst.msk [vmem:[#allocation2 + $0x28] sm:$0xff] %vm1289_vm4, %v1278_v46  ;;  %1297 = vst.msk [vmem:[#allocation2 + $0x38] sm:$0xff] %vm1289_vm4, %v1280_v48 }
 0x1db   :  { %1294 = vst.msk [vmem:[#allocation2 + $0x20] sm:$0xff] %vm1289_vm4, %v1277_v50  ;;  %1296 = vst.msk [vmem:[#allocation2 + $0x30] sm:$0xff] %vm1289_vm4, %v1279_v51  ;;  %v3244_v56 = vpop.f32.mrb[12].mxu0  ;;  %v3249_v57 = vpop.f32.mrb[12].mxu1 }
 0x1dc   :  { %v1282_v58 = vadd.f32 %v3244_v56, %v1266_v52  ;;  %v1284_v59 = vadd.f32 %v3249_v57, %v1268_v53  ;;  %v1023_v60 = vpop.f32.mrb[13].mxu0  ;;  %v1098_v61 = vpop.f32.mrb[13].mxu1 }
 0x1dd   :  { %v1918_v62 = vld [vmem:[#allocation2 + $0x9] sm:$0x1]  ;;  %v1919_v63 = vld [vmem:[#allocation2 + $0x19] sm:$0x1]  ;;  %v1856_v1 = vld [vmem:[#allocation2 + $0x8] sm:$0x1]  ;;  %v1281_v2 = vadd.f32 %v1265_v54, %v1023_v60  ;;  %v1283_v3 = vadd.f32 %v1267_v55, %v1098_v61 }
 0x1de   :  { %v1934_v4 = vrot.slane %v1919_v63, 7  ;;  %v1954_v5 = vrot.slane %v1918_v62, 4  ;;  %v1857_v6 = vld [vmem:[#allocation2 + $0x18] sm:$0x1]  ;;  %v1955_v7 = vrot.slane %v1919_v63, 3  ;;  %1299 = vst.msk [vmem:[#allocation2 + $0x48] sm:$0xff] %vm1289_vm4, %v1282_v58 }
 0x1df   :  { %1301 = vst.msk [vmem:[#allocation2 + $0x58] sm:$0xff] %vm1289_vm4, %v1284_v59  ;;  %v1892_v8 = vrot.slane %v1856_v1, 4  ;;  %v1893_v9 = vrot.slane %v1857_v6, 3  ;;  %v1984_v10 = vld [vmem:[#allocation2 + $0xa] sm:$0x1]  ;;  %1298 = vst.msk [vmem:[#allocation2 + $0x40] sm:$0xff] %vm1289_vm4, %v1281_v2 }
 0x1e0   :  { %v1985_v11 = vld [vmem:[#allocation2 + $0x1a] sm:$0x1]  ;;  %1300 = vst.msk [vmem:[#allocation2 + $0x50] sm:$0xff] %vm1289_vm4, %v1283_v3  ;;  %v1872_v12 = vrot.slane %v1857_v6, 7  ;;  %v2020_v13 = vrot.slane %v1984_v10, 4  ;;  %v1935_v17 = vsel %vm1335_vm5, %v1934_v4, %v1918_v62  ;;  %v1956_v19 = vsel %vm1360_vm8, %v1955_v7, %v1954_v5  ;;  %v3659_v45 = vpop.f32.mrb[14].mxu0 }
 0x1e1   :  { %v2021_v14 = vrot.slane %v1985_v11, 3  ;;  %v1920_v15 = vld [vmem:[#allocation2 + $0x29] sm:$0x1]  ;;  %v1921_v16 = vld [vmem:[#allocation2 + $0x39] sm:$0x1]  ;;  %v1894_v25 = vsel %vm1360_vm8, %v1893_v9, %v1892_v8  ;;  %v2000_v43 = vrot.slane %v1985_v11, 7 }
 0x1e2   :  { %v1858_v18 = vld [vmem:[#allocation2 + $0x28] sm:$0x1]  ;;  %v1936_v20 = vrot.slane %v1920_v15, 6  ;;  %v1938_v21 = vrot.slane %v1921_v16, 5  ;;  %v1859_v22 = vld [vmem:[#allocation2 + $0x38] sm:$0x1]  ;;  %v1873_v33 = vsel %vm1335_vm5, %v1872_v12, %v1856_v1 }
 0x1e3   :  { %v1895_v23 = vrot.slane %v1858_v18, 2  ;;  %v1957_v24 = vrot.slane %v1920_v15, 2  ;;  %v1897_v26 = vrot.slane %v1859_v22, 1  ;;  %v1874_v27 = vrot.slane %v1858_v18, 6  ;;  %v1986_v29 = vld [vmem:[#allocation2 + $0x2a] sm:$0x1] }
 0x1e4   :  { %v1876_v28 = vrot.slane %v1859_v22, 5  ;;  %v1937_v30 = vsel %vm1338_vm6, %v1936_v20, %v1935_v17  ;;  %v1959_v32 = vrot.slane %v1921_v16, 1  ;;  %v1987_v38 = vld [vmem:[#allocation2 + $0x3a] sm:$0x1]  ;;  %v2050_v39 = vld [vmem:[#allocation2 + $0xb] sm:$0x1]  ;;  %v2022_v46 = vsel %vm1360_vm8, %v2021_v14, %v2020_v13 }
 0x1e5   :  { %v1896_v31 = vsel %vm1363_vm9, %v1895_v23, %v1894_v25  ;;  %v3648_v34 = vsel %vm1341_vm7, %v1938_v21, %v1937_v30  ;;  %v1958_v36 = vsel %vm1363_vm9, %v1957_v24, %v1956_v19  ;;  %v1875_v37 = vsel %vm1338_vm6, %v1874_v27, %v1873_v33  ;;  %v2051_v40 = vld [vmem:[#allocation2 + $0x1b] sm:$0x1]  ;;  %v3657_v44 = vld [vmem:[#allocation2 + $0x2b] sm:$0x1]  ;;  %v3666_v53 = vld [vmem:[#allocation2 + $0xc] sm:$0x1] }
 0x1e6   :  { %v1898_v35 = vsel %vm1366_vm10, %v1897_v26, %v1896_v31  ;;  %1976 = vrot.lane.b32.xlu1 %v3648_v34, %s3484_s2  ;;  %v1877_v41 = vsel %vm1341_vm7, %v1876_v28, %v1875_v37  ;;  %v2023_v42 = vrot.slane %v1986_v29, 2  ;;  %v2002_v47 = vrot.slane %v1986_v29, 6  ;;  %v3663_v48 = vld [vmem:[#allocation2 + $0x3b] sm:$0x1]  ;;  %v2117_v58 = vld [vmem:[#allocation2 + $0x1c] sm:$0x1] }
 0x1e7   :  { %1906 = vrot.lane.b32.xlu0 %v1898_v35, %s3484_s2  ;;  %1916 = vst.msk [vmem:[#allocation3 + $0x20] sm:$0xf] %vm1386_vm11, %v1877_v41  ;;  %v1960_v49 = vsel %vm1366_vm10, %v1959_v32, %v1958_v36  ;;  %v2025_v50 = vrot.slane %v1987_v38, 1  ;;  %v2086_v51 = vrot.slane %v2050_v39, 4  ;;  %v2087_v52 = vrot.slane %v2051_v40, 3  ;;  %v3671_v59 = vpop.f32.mrb[15].mxu0 }
 0x1e8   :  { %v2024_v54 = vsel %vm1363_vm9, %v2023_v42, %v2022_v46  ;;  %v2001_v55 = vsel %vm1335_vm5, %v2000_v43, %v1984_v10  ;;  %v2004_v56 = vrot.slane %v1987_v38, 5  ;;  %v2089_v57 = vrot.slane %v3657_v44, 2  ;;  %v3676_v61 = vld [vmem:[#allocation2 + $0x1e] sm:$0x1]  ;;  %v2118_v63 = vld [vmem:[#allocation2 + $0x2c] sm:$0x1] }
 0x1e9   :  { %v2003_v60 = vsel %vm1338_vm6, %v2002_v47, %v2001_v55  ;;  %v2091_v62 = vrot.slane %v3663_v48, 1  ;;  %v3679_v1 = vld [vmem:[#allocation2 + $0x2e] sm:$0x1]  ;;  %v3681_v2 = vpop.f32.mrb[14].mxu1  ;;  %v2026_v3 = vsel %vm1366_vm10, %v2025_v50, %v2024_v54  ;;  %v2088_v4 = vsel %vm1360_vm8, %v2087_v52, %v2086_v51  ;;  %v3686_v7 = vld [vmem:[#allocation2 + $0x3e] sm:$0x1] }
 0x1ea   :  { %1884 = vrot.lane.b32.xlu1 %v1877_v41, %s3485_s30  ;;  %v2152_v5 = vrot.slane %v3666_v53, 4  ;;  %v2153_v6 = vrot.slane %v2117_v58, 3  ;;  %v3688_v8 = vpop.f32.mrb[15].mxu1  ;;  %v2005_v9 = vsel %vm1341_vm7, %v2004_v56, %v2003_v60  ;;  %v2090_v10 = vsel %vm1363_vm9, %v2089_v57, %v2088_v4  ;;  %v2119_v11 = vld [vmem:[#allocation2 + $0x3c] sm:$0x1] }
 0x1eb   :  { %1968 = vrot.lane.b32.xlu0 %v1960_v49, %s3485_s30  ;;  %v2066_v12 = vrot.slane %v2051_v40, 7  ;;  %v2264_v13 = vrot.slane %v3676_v61, 7  ;;  %v2155_v14 = vrot.slane %v2118_v63, 2  ;;  %v2068_v15 = vrot.slane %v3657_v44, 6  ;;  %v2248_v16 = vld [vmem:[#allocation2 + $0xe] sm:$0x1] }
 0x1ec   :  { %v2266_v17 = vrot.slane %v3679_v1, 6  ;;  %v2268_v19 = vrot.slane %v3686_v7, 5  ;;  %v3699_v20 = vld [vmem:[#allocation2 + $0xf] sm:$0x1]  ;;  %v2092_v21 = vsel %vm1366_vm10, %v2091_v62, %v2090_v10  ;;  %v2154_v22 = vsel %vm1360_vm8, %v2153_v6, %v2152_v5  ;;  %v3704_v25 = vld [vmem:[#allocation2 + $0x1f] sm:$0x1] }
 0x1ed   :  { %v2265_v18 = vsel %vm1335_vm5, %v2264_v13, %v2248_v16  ;;  %v2157_v23 = vrot.slane %v2119_v11, 1  ;;  %v3706_v26 = vld [vmem:[#allocation2 + $0x2f] sm:$0x1]  ;;  %v2067_v27 = vsel %vm1335_vm5, %v2066_v12, %v2050_v39  ;;  %v2070_v28 = vrot.slane %v3663_v48, 5  ;;  %v3711_v31 = vld [vmem:[#allocation2 + $0x3f] sm:$0x1] }
 0x1ee   :  { %2042 = vrot.lane.b32.xlu1 %v2005_v9, %s3485_s30  ;;  %v2267_v24 = vsel %vm1338_vm6, %v2266_v17, %v2265_v18  ;;  %v2132_v29 = vrot.slane %v2117_v58, 7  ;;  %v2156_v32 = vsel %vm1363_vm9, %v2155_v14, %v2154_v22  ;;  %v2069_v33 = vsel %vm1338_vm6, %v2068_v15, %v2067_v27  ;;  %v2183_v52 = vld [vmem:[#allocation2 + $0x1d] sm:$0x1]  ;;  %v2184_v54 = vld [vmem:[#allocation2 + $0x2d] sm:$0x1] }
 0x1ef   :  { %2034 = vrot.lane.b32.xlu0 %v2026_v3, %s3486_s8  ;;  %v2269_v30 = vsel %vm1341_vm7, %v2268_v19, %v2267_v24  ;;  %v2134_v35 = vrot.slane %v2118_v63, 6  ;;  %v2346_v36 = vrot.slane %v3699_v20, 4  ;;  %v2347_v37 = vrot.slane %v3704_v25, 3  ;;  %v3741_v55 = vld [vmem:[#allocation2 + $0x20] sm:$0x1] }
 0x1f0   :  { %2278 = vst.msk [vmem:[#allocation3 + $0x10] sm:$0xf] %vm1386_vm11, %v2269_v30  ;;  %v2349_v38 = vrot.slane %v3706_v26, 2  ;;  %v2136_v39 = vrot.slane %v2119_v11, 5  ;;  %v2351_v40 = vrot.slane %v3711_v31, 1  ;;  %v2158_v41 = vsel %vm1366_vm10, %v2157_v23, %v2156_v32 }
 0x1f1   :  { %v2133_v42 = vsel %vm1335_vm5, %v2132_v29, %v3666_v53  ;;  %v2348_v43 = vsel %vm1360_vm8, %v2347_v37, %v2346_v36  ;;  %v2280_v47 = vrot.slane %v2248_v16, 4  ;;  %v2281_v48 = vrot.slane %v3676_v61, 3  ;;  %v3737_v53 = vld [vmem:[#allocation2 + $0x10] sm:$0x1]  ;;  %v2182_v62 = vld [vmem:[#allocation2 + $0xd] sm:$0x1] }
 0x1f2   :  { %1946 = vrot.lane.b32.xlu1 %v3648_v34, %s3486_s8  ;;  %v2071_v34 = vsel %vm1341_vm7, %v2070_v28, %v2069_v33  ;;  %v2135_v44 = vsel %vm1338_vm6, %v2134_v35, %v2133_v42  ;;  %v2350_v46 = vsel %vm1363_vm9, %v2349_v38, %v2348_v43  ;;  %v2283_v50 = vrot.slane %v3679_v1, 2  ;;  %v3743_v56 = vld [vmem:[#allocation2 + $0x30] sm:$0x1]  ;;  %v2185_v63 = vld [vmem:[#allocation2 + $0x3d] sm:$0x1]  ;;  %v1270_v36 = vld [vmem:[#allocation7 + $0x68] sm:$0xff] }
 0x1f3   :  { %2100 = vrot.lane.b32.xlu0 %v2092_v21, %s3487_s9  ;;  %v2352_v49 = vsel %vm1366_vm10, %v2351_v40, %v2350_v46  ;;  %v2137_v51 = vsel %vm1341_vm7, %v2136_v39, %v2135_v44  ;;  %v2282_v57 = vsel %vm1360_vm8, %v2281_v48, %v2280_v47  ;;  %v2285_v58 = vrot.slane %v3686_v7, 1  ;;  %v3751_v6 = vld [vmem:[#allocation2] sm:$0x1]  ;;  %v3758_v11 = vld [vmem:[#allocation2 + $0x17] sm:$0x1] }
 0x1f4   :  { %2362 = vst.msk [vmem:[#allocation3 + $0x10] sm:$0xf0] %vm1845_vm12, %v2352_v49  ;;  %v2326_v60 = vrot.slane %v3704_v25, 7  ;;  %v2284_v61 = vsel %vm1363_vm9, %v2283_v50, %v2282_v57  ;;  %v2198_v1 = vrot.slane %v2183_v52, 7  ;;  %v1334_v3 = vrot.slane %v3737_v53, 7  ;;  %v1271_v46 = vld [vmem:[#allocation7 + $0x70] sm:$0xff] }
 0x1f5   :  { %v2328_v4 = vrot.slane %v3706_v26, 6  ;;  %v2200_v5 = vrot.slane %v2184_v54, 6  ;;  %v1340_v10 = vrot.slane %v3743_v56, 5  ;;  %v2330_v7 = vrot.slane %v3711_v31, 5  ;;  %v3765_v16 = vld [vmem:[#allocation2 + $0x27] sm:$0x1] }
 0x1f6   :  { %2108 = vrot.lane.b32.xlu1 %v2071_v34, %s3486_s8  ;;  %v1336_v12 = vsel %vm1335_vm5, %v1334_v3, %v3751_v6  ;;  %v2286_v13 = vsel %vm1366_vm10, %v2285_v58, %v2284_v61  ;;  %v2327_v14 = vsel %vm1335_vm5, %v2326_v60, %v3699_v20  ;;  %v2202_v15 = vrot.slane %v2185_v63, 5  ;;  %v3779_v20 = vld [vmem:[#allocation2 + $0x37] sm:$0x1]  ;;  %v3782_v28 = vld [vmem:[#allocation2 + $0x11] sm:$0x1] }
 0x1f7   :  { %2166 = vrot.lane.b32.xlu0 %v2158_v41, %s3488_s10  ;;  %v2199_v18 = vsel %vm1335_vm5, %v2198_v1, %v2182_v62  ;;  %v2218_v19 = vrot.slane %v2182_v62, 4  ;;  %v2219_v21 = vrot.slane %v2183_v52, 3  ;;  %v2329_v23 = vsel %vm1338_vm6, %v2328_v4, %v2327_v14  ;;  %v3784_v29 = vld [vmem:[#allocation2 + $0x21] sm:$0x1]  ;;  %v3791_v35 = vld [vmem:[#allocation2 + $0x7] sm:$0x1] }
 0x1f8   :  { %v2201_v24 = vsel %vm1338_vm6, %v2200_v5, %v2199_v18  ;;  %v2221_v25 = vrot.slane %v2184_v54, 2  ;;  %v1809_v26 = vrot.slane %v3758_v11, 7  ;;  %v1811_v27 = vrot.slane %v3765_v16, 6  ;;  %v1269_v41 = vld [vmem:[#allocation7 + $0x60] sm:$0xff]  ;;  %v3802_v43 = vld [vmem:[#allocation2 + $0x31] sm:$0x1] }
 0x1f9   :  { %v2203_v31 = vsel %vm1341_vm7, %v2202_v15, %v2201_v24  ;;  %v2220_v32 = vsel %vm1360_vm8, %v2219_v21, %v2218_v19  ;;  %v2223_v33 = vrot.slane %v2185_v63, 1  ;;  %v1813_v39 = vrot.slane %v3779_v20, 5  ;;  %v1389_v49 = vld [vmem:[#allocation2 + $0x1] sm:$0x1]  ;;  %v3809_v52 = vld [vmem:[#allocation2 + $0x16] sm:$0x1] }
 0x1fa   :  { %2012 = vrot.lane.b32.xlu1 %v2005_v9, %s3487_s9  ;;  %v1337_v9 = vrot.slane %v3741_v55, 6  ;;  %v2222_v37 = vsel %vm1363_vm9, %v2221_v25, %v2220_v32  ;;  %v1810_v38 = vsel %vm1335_vm5, %v1809_v26, %v3791_v35  ;;  %v1405_v40 = vrot.slane %v3782_v28, 7  ;;  %v3818_v60 = vld [vmem:[#allocation2 + $0x26] sm:$0x1]  ;;  %v3820_v61 = vld [vmem:[#allocation2 + $0x36] sm:$0x1] }
 0x1fb   :  { %2144 = vrot.lane.b32.xlu0 %v2137_v51, %s3489_s13  ;;  %v1812_v42 = vsel %vm1338_vm6, %v1811_v27, %v1810_v38  ;;  %v1407_v44 = vrot.slane %v3784_v29, 6  ;;  %v1286_v47 = vadd.f32 %v3659_v45, %v1270_v36  ;;  %v2224_v48 = vsel %vm1366_vm10, %v2223_v33, %v2222_v37  ;;  %v1460_v62 = vld [vmem:[#allocation2 + $0x22] sm:$0x1]  ;;  %v3832_v3 = vld [vmem:[#allocation2 + $0x6] sm:$0x1] }
 0x1fc   :  { %v1339_v17 = vsel %vm1338_vm6, %v1337_v9, %v1336_v12  ;;  %v1285_v50 = vadd.f32 %v1269_v41, %v3671_v59  ;;  %v3812_v54 = vsel %vm1341_vm7, %v1813_v39, %v1812_v42  ;;  %v1406_v57 = vsel %vm1335_vm5, %v1405_v40, %v1389_v49  ;;  %v1458_v18 = vld [vmem:[#allocation2 + $0x2] sm:$0x1]  ;;  %v1527_v25 = vld [vmem:[#allocation2 + $0x13] sm:$0x1]  ;;  %v1528_v27 = vld [vmem:[#allocation2 + $0x23] sm:$0x1] }
 0x1fd   :  { %v3770_v22 = vsel %vm1341_vm7, %v1340_v10, %v1339_v17  ;;  %v1409_v58 = vrot.slane %v3802_v43, 5  ;;  %1303 = vst.msk [vmem:[#allocation2 + $0x68] sm:$0xff] %vm1289_vm4, %v1286_v47  ;;  %v1287_v45 = vadd.f32 %v1271_v46, %v3688_v8  ;;  %v1408_v59 = vsel %vm1338_vm6, %v1407_v44, %v1406_v57  ;;  %v1526_v37 = vld [vmem:[#allocation2 + $0x3] sm:$0x1]  ;;  %v1529_v40 = vld [vmem:[#allocation2 + $0x33] sm:$0x1] }
 0x1fe   :  { %2174 = vrot.lane.b32.xlu1 %v2137_v51, %s3487_s9  ;;  %1387 = vst.msk [vmem:[#allocation3 + $0x18] sm:$0xf] %vm1386_vm11, %v3770_v22  ;;  %v1746_v8 = vrot.slane %v3809_v52, 7  ;;  %v1358_v63 = vrot.slane %v3751_v6, 4  ;;  %v1359_v1 = vrot.slane %v3737_v53, 3  ;;  %v1748_v4 = vrot.slane %v3818_v60, 6 }
 0x1ff   :  { %2302 = vrot.lane.b32.xlu0 %v2269_v30, %s3489_s13  ;;  %v3787_v30 = vsel %vm1341_vm7, %v2330_v7, %v2329_v23  ;;  %1302 = vst.msk [vmem:[#allocation2 + $0x60] sm:$0xff] %vm1289_vm4, %v1285_v50  ;;  %1304 = vst.msk [vmem:[#allocation2 + $0x70] sm:$0xff] %vm1289_vm4, %v1287_v45  ;;  %v1750_v5 = vrot.slane %v3820_v61, 5  ;;  %v1410_v9 = vsel %vm1341_vm7, %v1409_v58, %v1408_v59  ;;  %v1362_v10 = vrot.slane %v3741_v55, 2  ;;  %v1461_v6 = vld [vmem:[#allocation2 + $0x32] sm:$0x1] }
 0x200   :  { %v1747_v12 = vsel %vm1335_vm5, %v1746_v8, %v3832_v3  ;;  %v1476_v53 = vrot.slane %v1460_v62, 6  ;;  %v1426_v15 = vrot.slane %v1389_v49, 4  ;;  %v1361_v17 = vsel %vm1360_vm8, %v1359_v1, %v1358_v63  ;;  %v3866_v41 = vld [vmem:[#allocation2 + $0x58] sm:$0x1]  ;;  %v3875_v57 = vld [vmem:[#allocation2 + $0x48] sm:$0x1] }
 0x201   :  { %v1365_v55 = vrot.slane %v3743_v56, 1  ;;  %v1364_v19 = vsel %vm1363_vm9, %v1362_v10, %v1361_v17  ;;  %v1478_v23 = vrot.slane %v1461_v6, 5  ;;  %v1427_v24 = vrot.slane %v3782_v28, 3  ;;  %v1595_v8 = vld [vmem:[#allocation2 + $0x14] sm:$0x1] }
 0x202   :  { %2078 = vrot.lane.b32.xlu1 %v2071_v34, %s3488_s10  ;;  %v1272_v34 = vld [vmem:[#allocation7 + $0x78] sm:$0xff]  ;;  %v1429_v26 = vrot.slane %v3784_v29, 2  ;;  %v1498_v36 = vrot.slane %v1460_v62, 2  ;;  %v1542_v38 = vrot.slane %v1527_v25, 7  ;;  %v1500_v44 = vrot.slane %v1461_v6, 1 }
 0x203   :  { %2294 = vrot.lane.b32.xlu0 %v2286_v13, %s3490_s14  ;;  %v1288_v51 = vadd.f32 %v3681_v2, %v1272_v34  ;;  %v1459_v2 = vld [vmem:[#allocation2 + $0x12] sm:$0x1]  ;;  %v1749_v13 = vsel %vm1338_vm6, %v1748_v4, %v1747_v12  ;;  %v1367_v33 = vsel %vm1366_vm10, %v1365_v55, %v1364_v19  ;;  %v1428_v39 = vsel %vm1360_vm8, %v1427_v24, %v1426_v15  ;;  %v1594_v62 = vld [vmem:[#allocation2 + $0x4] sm:$0x1]  ;;  %v1597_v55 = vld [vmem:[#allocation2 + $0x34] sm:$0x1] }
 0x204   :  { %v1474_v7 = vrot.slane %v1459_v2, 7  ;;  %v3844_v14 = vsel %vm1341_vm7, %v1750_v5, %v1749_v13  ;;  %v1496_v32 = vrot.slane %v1459_v2, 3  ;;  %v1430_v29 = vsel %vm1363_vm9, %v1429_v26, %v1428_v39  ;;  %v3868_v34 = vld [vmem:[#allocation2 + $0x68] sm:$0x1]  ;;  %v1596_v5 = vld [vmem:[#allocation2 + $0x24] sm:$0x1] }
 0x205   :  { %1305 = vst.msk [vmem:[#allocation2 + $0x78] sm:$0xff] %vm1289_vm4, %v1288_v51  ;;  %v1563_v46 = vrot.slane %v1526_v37, 4  ;;  %v1564_v47 = vrot.slane %v1527_v25, 3  ;;  %v1543_v49 = vsel %vm1335_vm5, %v1542_v38, %v1526_v37  ;;  %v1546_v50 = vrot.slane %v1529_v40, 5  ;;  %v1662_v38 = vld [vmem:[#allocation2 + $0x5] sm:$0x1] }
 0x206   :  { %2240 = vrot.lane.b32.xlu1 %v2203_v31, %s3488_s10  ;;  %1760 = vst.msk [vmem:[#allocation3 + $0x8] sm:$0xf] %vm1386_vm11, %v3844_v14  ;;  %v1475_v21 = vsel %vm1335_vm5, %v1474_v7, %v1458_v18  ;;  %v1566_v51 = vrot.slane %v1528_v27, 2  ;;  %v1878_v59 = vrot.slane %v3866_v41, 7  ;;  %v1880_v2 = vrot.slane %v3868_v34, 6 }
 0x207   :  { %2364 = vrot.lane.b32.xlu0 %v3787_v30, %s3490_s14  ;;  %v1477_v56 = vsel %vm1338_vm6, %v1476_v53, %v1475_v21  ;;  %v1565_v4 = vsel %vm1360_vm8, %v1564_v47, %v1563_v46  ;;  %v1568_v6 = vrot.slane %v1529_v40, 1  ;;  %v1632_v13 = vrot.slane %v1595_v8, 3  ;;  %v3912_v39 = vld [vmem:[#allocation2 + $0x6e] sm:$0x1] }
 0x208   :  { %v1479_v28 = vsel %vm1341_vm7, %v1478_v23, %v1477_v56  ;;  %v1879_v10 = vsel %vm1335_vm5, %v1878_v59, %v3875_v57  ;;  %v1567_v12 = vsel %vm1363_vm9, %v1566_v51, %v1565_v4  ;;  %v1610_v15 = vrot.slane %v1595_v8, 7 }
 0x209   :  { %v1881_v53 = vsel %vm1338_vm6, %v1880_v2, %v1879_v10  ;;  %v1612_v19 = vrot.slane %v1596_v5, 6  ;;  %v1829_v21 = vrot.slane %v3791_v35, 4  ;;  %v1830_v23 = vrot.slane %v3758_v11, 3 }
 0x20a   :  { %2232 = vrot.lane.b32.xlu1 %v2224_v48, %s3489_s13  ;;  %v1832_v24 = vrot.slane %v3765_v16, 2  ;;  %v1569_v25 = vsel %vm1366_vm10, %v1568_v6, %v1567_v12  ;;  %v1636_v26 = vrot.slane %v1597_v55, 1  ;;  %v1664_v16 = vld [vmem:[#allocation2 + $0x25] sm:$0x1]  ;;  %v1763_v59 = vrot.slane %v3809_v52, 3 }
 0x20b   :  { %1821 = vrot.lane.b32.xlu0 %v3812_v54, %s3484_s2  ;;  %v1831_v37 = vsel %vm1360_vm8, %v1830_v23, %v1829_v21  ;;  %v1924_v52 = vld [vmem:[#allocation2 + $0x69] sm:$0x1]  ;;  %v3943_v6 = vld [vmem:[#allocation2 + $0x5f] sm:$0x1]  ;;  %vm4526_vm4 = vcmask 654852  }
 0x20c   :  { %v3871_v48 = vld [vmem:[#allocation2 + $0x78] sm:$0x1] }
 0x20d   :  { %v1882_v63 = vrot.slane %v3871_v48, 5 }
 0x20e   :  { %2210 = vrot.lane.b32.xlu1 %v2203_v31, %s3490_s14  ;;  %v1495_v31 = vrot.slane %v1458_v18, 4  ;;  %v1634_v18 = vrot.slane %v1596_v5, 2  ;;  %v1702_v5 = vrot.slane %v1664_v16, 2 }
 0x20f   :  { %1449 = vrot.lane.b32.xlu0 %v1410_v9, %s3484_s2  ;;  %v3892_v17 = vsel %vm1341_vm7, %v1882_v63, %v1881_v53  ;;  %v3949_v53 = vld [vmem:[#allocation2 + $0x7f] sm:$0x1] }
 0x210   :  { %v1497_v42 = vsel %vm1360_vm8, %v1496_v32, %v1495_v31  ;;  %1917 = vst.msk [vmem:[#allocation3 + $0x50] sm:$0xf] %vm1386_vm11, %v3892_v17  ;;  %v1614_v31 = vrot.slane %v1597_v55, 5  ;;  %v1834_v32 = vrot.slane %v3779_v20, 1  ;;  %v1922_v55 = vld [vmem:[#allocation2 + $0x49] sm:$0x1] }
 0x212   :  { %2338 = vrot.lane.b32.xlu1 %v3787_v30, %s3484_s2  ;;  %v1431_v30 = vrot.slane %v3802_v43, 1  ;;  %v1499_v43 = vsel %vm1363_vm9, %v1498_v36, %v1497_v42  ;;  %v3909_v36 = vld [vmem:[#allocation2 + $0x5e] sm:$0x1]  ;;  %v3919_v42 = vld [vmem:[#allocation2 + $0x4e] sm:$0x1] }
 0x213   :  { %1349 = vrot.lane.b32.xlu0 %v3770_v22, %s3485_s30  ;;  %v1544_v22 = vrot.slane %v1528_v27, 6  ;;  %v1501_v1 = vsel %vm1366_vm10, %v1500_v44, %v1499_v43  ;;  %v1611_v27 = vsel %vm1335_vm5, %v1610_v15, %v1594_v62  ;;  %v1680_v44 = vrot.slane %v1664_v16, 6 }
 0x214   :  { %v1432_v58 = vsel %vm1366_vm10, %v1431_v30, %v1430_v29  ;;  %v1613_v11 = vsel %vm1338_vm6, %v1612_v19, %v1611_v27  ;;  %v3914_v30 = vld [vmem:[#allocation2 + $0x7e] sm:$0x1]  ;;  %v1833_v29 = vsel %vm1363_vm9, %v1832_v24, %v1831_v37  ;;  %v2270_v47 = vrot.slane %v3909_v36, 7 }
 0x215   :  { %v1545_v45 = vsel %vm1338_vm6, %v1544_v22, %v1543_v49  ;;  %v1615_v40 = vsel %vm1341_vm7, %v1614_v31, %v1613_v11  ;;  %v1835_v46 = vsel %vm1366_vm10, %v1834_v32, %v1833_v29  ;;  %v1762_v43 = vrot.slane %v3832_v3, 4  ;;  %v1923_v49 = vld [vmem:[#allocation2 + $0x59] sm:$0x1]  ;;  %v3977_v29 = vld [vmem:[#allocation2 + $0x5b] sm:$0x1] }
 0x216   :  { %1375 = vrot.lane.b32.xlu1 %v1367_v33, %s3484_s2  ;;  %v1547_v7 = vsel %vm1341_vm7, %v1546_v50, %v1545_v45  ;;  %v1663_v33 = vld [vmem:[#allocation2 + $0x15] sm:$0x1]  ;;  %1846 = vst.msk [vmem:[#allocation3 + $0x8] sm:$0xf0] %vm1845_vm12, %v1835_v46  ;;  %v2272_v50 = vrot.slane %v3912_v39, 6  ;;  %v2274_v51 = vrot.slane %v3914_v30, 5  ;;  %v2271_v2 = vsel %vm1335_vm5, %v2270_v47, %v3919_v42 }
 0x217   :  { %1518 = vrot.lane.b32.xlu0 %v1479_v28, %s3485_s30  ;;  %v1678_v22 = vrot.slane %v1663_v33, 7  ;;  %v1699_v45 = vrot.slane %v1662_v38, 4  ;;  %v1765_v3 = vrot.slane %v3818_v60, 2  ;;  %v1700_v63 = vrot.slane %v1663_v33, 3  ;;  %v3947_v60 = vld [vmem:[#allocation2 + $0x6f] sm:$0x1] }
 0x218   :  { %v1940_v10 = vrot.slane %v1923_v49, 7  ;;  %v1767_v15 = vrot.slane %v3820_v61, 1  ;;  %v2358_v19 = vrot.slane %v3949_v53, 1  ;;  %v1942_v27 = vrot.slane %v1924_v52, 6  ;;  %v3981_v46 = vld [vmem:[#allocation2 + $0x60] sm:$0x1] }
 0x219   :  { %v1679_v8 = vsel %vm1335_vm5, %v1678_v22, %v1662_v38  ;;  %v1701_v23 = vsel %vm1360_vm8, %v1700_v63, %v1699_v45  ;;  %v1962_v11 = vrot.slane %v1923_v49, 3  ;;  %v1900_v22 = vrot.slane %v3866_v41, 3  ;;  %v3984_v49 = vld [vmem:[#allocation2 + $0x70] sm:$0x1]  ;;  %v1989_v41 = vld [vmem:[#allocation2 + $0x5a] sm:$0x1] }
 0x21a   :  { %1440 = vrot.lane.b32.xlu1 %v1432_v58, %s3485_s30  ;;  %v1681_v4 = vsel %vm1338_vm6, %v1680_v44, %v1679_v8  ;;  %v1703_v61 = vsel %vm1363_vm9, %v1702_v5, %v1701_v23  ;;  %v1941_v32 = vsel %vm1335_vm5, %v1940_v10, %v1922_v55  ;;  %v3979_v44 = vld [vmem:[#allocation2 + $0x50] sm:$0x1]  ;;  %v3993_v45 = vld [vmem:[#allocation2 + $0x6b] sm:$0x1]  ;;  %v1345_v8 = vrot.slane %v3981_v46, 6 }
 0x21b   :  { %1417 = vrot.lane.b32.xlu0 %v1410_v9, %s3486_s8  ;;  %v1631_v9 = vrot.slane %v1594_v62, 4  ;;  %v3932_v62 = vld [vmem:[#allocation2 + $0x4f] sm:$0x1]  ;;  %v1943_v38 = vsel %vm1338_vm6, %v1942_v27, %v1941_v32  ;;  %v1347_v63 = vrot.slane %v3984_v49, 5  ;;  %v4011_v10 = vld [vmem:[#allocation2 + $0x7b] sm:$0x1] }
 0x21c   :  { %v4033_v27 = vld [vmem:[#allocation2 + $0x4c] sm:$0x1]  ;;  %v4035_v32 = vld [vmem:[#allocation2 + $0x47] sm:$0x1] }
 0x21d   :  { %v1633_v56 = vsel %vm1360_vm8, %v1632_v13, %v1631_v9  ;;  %v2353_v9 = vrot.slane %v3932_v62, 4  ;;  %v1764_v13 = vsel %vm1360_vm8, %v1763_v59, %v1762_v43  ;;  %v2072_v59 = vrot.slane %v3977_v29, 7 }
 0x21e   :  { %1509 = vrot.lane.b32.xlu1 %v1501_v1, %s3486_s8  ;;  %v1635_v35 = vsel %vm1363_vm9, %v1634_v18, %v1633_v56  ;;  %v2273_v1 = vsel %vm1338_vm6, %v2272_v50, %v2271_v2  ;;  %v2356_v18 = vrot.slane %v3947_v60, 2  ;;  %v1766_v56 = vsel %vm1363_vm9, %v1765_v3, %v1764_v13  ;;  %v3998_v3 = vld [vmem:[#allocation2 + $0x4b] sm:$0x1] }
 0x21f   :  { %1586 = vrot.lane.b32.xlu0 %v1547_v7, %s3486_s8  ;;  %v1637_v20 = vsel %vm1366_vm10, %v1636_v26, %v1635_v35  ;;  %v3941_v12 = vsel %vm1341_vm7, %v2274_v51, %v2273_v1  ;;  %v1925_v26 = vld [vmem:[#allocation2 + $0x79] sm:$0x1]  ;;  %v1961_v35 = vrot.slane %v1922_v55, 4  ;;  %v3990_v51 = vld [vmem:[#allocation2 + $0x40] sm:$0x1]  ;;  %v1343_v2 = vrot.slane %v3979_v44, 7 }
 0x220   :  { %2279 = vst.msk [vmem:[#allocation3 + $0x40] sm:$0xf] %vm1386_vm11, %v3941_v12  ;;  %v1944_v37 = vrot.slane %v1925_v26, 5  ;;  %v1966_v43 = vrot.slane %v1925_v26, 1  ;;  %v2006_v13 = vrot.slane %v1989_v41, 7 }
 0x221   :  { %v1344_v5 = vsel %vm1335_vm5, %v1343_v2, %v3990_v51  ;;  %v1988_v55 = vld [vmem:[#allocation2 + $0x4a] sm:$0x1]  ;;  %v4067_v2 = vld [vmem:[#allocation2 + $0x66] sm:$0x1] }
 0x222   :  { %1577 = vrot.lane.b32.xlu1 %v1569_v25, %s3487_s9  ;;  %v1945_v47 = vsel %vm1341_vm7, %v1944_v37, %v1943_v38  ;;  %v2027_v26 = vrot.slane %v1988_v55, 4 }
 0x223   :  { %1486 = vrot.lane.b32.xlu0 %v1479_v28, %s3487_s9  ;;  %v1665_v28 = vld [vmem:[#allocation2 + $0x35] sm:$0x1] }
 0x224   :  { %v1682_v58 = vrot.slane %v1665_v28, 5  ;;  %v1704_v24 = vrot.slane %v1665_v28, 1  ;;  %v1899_v28 = vrot.slane %v3875_v57, 4  ;;  %v1902_v57 = vrot.slane %v3868_v34, 2 }
 0x225   :  { %v1904_v34 = vrot.slane %v3871_v48, 1  ;;  %v1346_v48 = vsel %vm1338_vm6, %v1345_v8, %v1344_v5  ;;  %v2096_v5 = vrot.slane %v3993_v45, 2 }
 0x226   :  { %1645 = vrot.lane.b32.xlu1 %v1637_v20, %s3488_s10  ;;  %v1683_v21 = vsel %vm1341_vm7, %v1682_v58, %v1681_v4  ;;  %v1705_v16 = vsel %vm1366_vm10, %v1704_v24, %v1703_v61  ;;  %v1964_v20 = vrot.slane %v1924_v52, 2  ;;  %v1901_v58 = vsel %vm1360_vm8, %v1900_v22, %v1899_v28  ;;  %v4003_v4 = vld [vmem:[#allocation2 + $0x5c] sm:$0x1]  ;;  %v4026_v24 = vld [vmem:[#allocation2 + $0x6c] sm:$0x1] }
 0x227   :  { %1654 = vrot.lane.b32.xlu0 %v1615_v40, %s3487_s9  ;;  %v1903_v52 = vsel %vm1363_vm9, %v1902_v57, %v1901_v58  ;;  %v2007_v61 = vsel %vm1335_vm5, %v2006_v13, %v1988_v55  ;;  %v4055_v22 = vld [vmem:[#allocation2 + $0x5d] sm:$0x1]  ;;  %v4063_v58 = vld [vmem:[#allocation2 + $0x6d] sm:$0x1] }
 0x228   :  { %v2204_v55 = vrot.slane %v4055_v22, 7 }
 0x22a   :  { %1622 = vrot.lane.b32.xlu1 %v1615_v40, %s3489_s13  ;;  %v1963_v40 = vsel %vm1360_vm8, %v1962_v11, %v1961_v35  ;;  %v4038_v11 = vld [vmem:[#allocation2 + $0x7c] sm:$0x1] }
 0x22b   :  { %1554 = vrot.lane.b32.xlu0 %v1547_v7, %s3488_s10  ;;  %v2354_v7 = vrot.slane %v3943_v6, 3  ;;  %v1965_v50 = vsel %vm1363_vm9, %v1964_v20, %v1963_v40  ;;  %v4047_v20 = vld [vmem:[#allocation2 + $0x57] sm:$0x1]  ;;  %v2093_v40 = vrot.slane %v3998_v3, 4  ;;  %v2142_v57 = vrot.slane %v4038_v11, 5 }
 0x22c   :  { %v1967_v1 = vsel %vm1366_vm10, %v1966_v43, %v1965_v50  ;;  %v1836_v43 = vrot.slane %v4035_v32, 4  ;;  %v1837_v50 = vrot.slane %v4047_v20, 3 }
 0x22d   :  { %v2355_v25 = vsel %vm1360_vm8, %v2354_v7, %v2353_v9  ;;  %v2074_v9 = vrot.slane %v3993_v45, 6  ;;  %v1990_v7 = vld [vmem:[#allocation2 + $0x6a] sm:$0x1]  ;;  %v1754_v45 = vrot.slane %v4067_v2, 6 }
 0x22e   :  { %1785 = vrot.lane.b32.xlu1 %v3844_v14, %s3489_s13  ;;  %v2357_v31 = vsel %vm1363_vm9, %v2356_v18, %v2355_v25  ;;  %v1768_v14 = vsel %vm1366_vm10, %v1767_v15, %v1766_v56  ;;  %v2073_v15 = vsel %vm1335_vm5, %v2072_v59, %v3998_v3  ;;  %v4018_v18 = vsel %vm1341_vm7, %v1347_v63, %v1346_v48  ;;  %v4065_v59 = vld [vmem:[#allocation2 + $0x56] sm:$0x1] }
 0x22f   :  { %1722 = vrot.lane.b32.xlu0 %v1683_v21, %s3488_s10  ;;  %v2359_v33 = vsel %vm1366_vm10, %v2358_v19, %v2357_v31  ;;  %1388 = vst.msk [vmem:[#allocation3 + $0x48] sm:$0xf] %vm1386_vm11, %v4018_v18  ;;  %v1905_v19 = vsel %vm1366_vm10, %v1904_v34, %v1903_v52  ;;  %v2008_v23 = vrot.slane %v1990_v7, 6  ;;  %v2138_v25 = vrot.slane %v4003_v4, 7  ;;  %v4075_v34 = vld [vmem:[#allocation2 + $0x76] sm:$0x1] }
 0x230   :  { %2363 = vst.msk [vmem:[#allocation3 + $0x40] sm:$0xf0] %vm1845_vm12, %v2359_v33  ;;  %v2075_v56 = vsel %vm1338_vm6, %v2074_v9, %v2073_v15  ;;  %v2028_v31 = vrot.slane %v1989_v41, 3  ;;  %v2140_v33 = vrot.slane %v4026_v24, 6  ;;  %v2030_v38 = vrot.slane %v1990_v7, 2 }
 0x231   :  { %v2139_v37 = vsel %vm1335_vm5, %v2138_v25, %v4033_v27  ;;  %v2094_v41 = vrot.slane %v3977_v29, 3  ;;  %v2159_v3 = vrot.slane %v4033_v27, 4  ;;  %v4080_v9 = vld [vmem:[#allocation2 + $0x46] sm:$0x1]  ;;  %v1838_v7 = vsel %vm1360_vm8, %v1837_v50, %v1836_v43  ;;  %v2186_v25 = vld [vmem:[#allocation2 + $0x4d] sm:$0x1] }
 0x232   :  { %1776 = vrot.lane.b32.xlu1 %v1768_v14, %s3490_s14  ;;  %v2029_v28 = vsel %vm1360_vm8, %v2028_v31, %v2027_v26  ;;  %v2141_v8 = vsel %vm1338_vm6, %v2140_v33, %v2139_v37  ;;  %v1752_v48 = vrot.slane %v4065_v59, 7  ;;  %v2205_v37 = vsel %vm1335_vm5, %v2204_v55, %v2186_v25 }
 0x233   :  { %1713 = vrot.lane.b32.xlu0 %v1705_v16, %s3489_s13  ;;  %v2009_v16 = vsel %vm1338_vm6, %v2008_v23, %v2007_v61  ;;  %v2031_v29 = vsel %vm1363_vm9, %v2030_v38, %v2029_v28  ;;  %v2095_v15 = vsel %vm1360_vm8, %v2094_v41, %v2093_v40  ;;  %v2098_v23 = vrot.slane %v4011_v10, 1 }
 0x234   :  { %v1753_v61 = vsel %vm1335_vm5, %v1752_v48, %v4080_v9  ;;  %v2225_v38 = vrot.slane %v2186_v25, 4  ;;  %v2226_v28 = vrot.slane %v4055_v22, 3  ;;  %v2164_v50 = vrot.slane %v4038_v11, 1 }
 0x235   :  { %v1755_v27 = vsel %vm1338_vm6, %v1754_v45, %v1753_v61  ;;  %v2228_v22 = vrot.slane %v4063_v58, 2  ;;  %v2334_v48 = vrot.slane %v3947_v60, 6  ;;  %v1395_v45 = vld [vmem:[#allocation2 + $0x61] sm:$0x1]  ;;  %v1396_v60 = vld [vmem:[#allocation2 + $0x71] sm:$0x1] }
 0x236   :  { %1978 = vrot.lane.b32.xlu1 %v1945_v47, %s3484_s2 }
 0x237   :  { %1690 = vrot.lane.b32.xlu0 %v1683_v21, %s3490_s14  ;;  %v2076_v21 = vrot.slane %v4011_v10, 5  ;;  %v2189_v10 = vld [vmem:[#allocation2 + $0x7d] sm:$0x1] }
 0x238   :  { %v2208_v43 = vrot.slane %v2189_v10, 5 }
 0x239   :  { %v4042_v14 = vsel %vm1341_vm7, %v2076_v21, %v2075_v56  ;;  %v2143_v21 = vsel %vm1341_vm7, %v2142_v57, %v2141_v8  ;;  %v2206_v56 = vrot.slane %v4063_v58, 6  ;;  %v2287_v8 = vrot.slane %v3919_v42, 4  ;;  %v1394_v42 = vld [vmem:[#allocation2 + $0x51] sm:$0x1] }
 0x23a   :  { %1970 = vrot.lane.b32.xlu1 %v1967_v1, %s3485_s30  ;;  %v4073_v1 = vld [vmem:[#allocation2 + $0x77] sm:$0x1]  ;;  %v1434_v61 = vrot.slane %v1394_v42, 3 }
 0x23b   :  { %1848 = vrot.lane.b32.xlu0 %v3812_v54, %s3490_s14  ;;  %v4020_v54 = vld [vmem:[#allocation2 + $0x7a] sm:$0x1]  ;;  %v1841_v13 = vrot.slane %v4073_v1, 1  ;;  %v2207_v57 = vsel %vm1338_vm6, %v2206_v56, %v2205_v37  ;;  %v1815_v56 = vrot.slane %v4047_v20, 7  ;;  %v1436_v20 = vrot.slane %v1395_v45, 2 }
 0x23c   :  { %v2010_v35 = vrot.slane %v4020_v54, 5  ;;  %v2032_v63 = vrot.slane %v4020_v54, 1  ;;  %v2160_v54 = vrot.slane %v4003_v4, 3  ;;  %v2097_v4 = vsel %vm1363_vm9, %v2096_v5, %v2095_v15 }
 0x23d   :  { %v2290_v5 = vrot.slane %v3912_v39, 2  ;;  %v1369_v37 = vrot.slane %v3979_v44, 3 }
 0x23e   :  { %1948 = vrot.lane.b32.xlu1 %v1945_v47, %s3486_s8  ;;  %v4057_v47 = vld [vmem:[#allocation2 + $0x67] sm:$0x1]  ;;  %v2033_v26 = vsel %vm1366_vm10, %v2032_v63, %v2031_v29  ;;  %v2161_v40 = vsel %vm1360_vm8, %v2160_v54, %v2159_v3  ;;  %v2288_v3 = vrot.slane %v3909_v36, 3  ;;  %v2209_v63 = vsel %vm1341_vm7, %v2208_v43, %v2207_v57  ;;  %v1393_v54 = vld [vmem:[#allocation2 + $0x41] sm:$0x1] }
 0x23f   :  { %1908 = vrot.lane.b32.xlu0 %v1905_v19, %s3484_s2  ;;  %v1839_v52 = vrot.slane %v4057_v47, 2  ;;  %v1756_v19 = vrot.slane %v4075_v34, 5  ;;  %v2230_v29 = vrot.slane %v2189_v10, 1  ;;  %v1433_v25 = vrot.slane %v1393_v54, 4  ;;  %v4180_v57 = vld [vmem:[#allocation2 + $0x63] sm:$0x1] }
 0x240   :  { %v2289_v58 = vsel %vm1360_vm8, %v2288_v3, %v2287_v8  ;;  %v1816_v10 = vsel %vm1335_vm5, %v1815_v56, %v4035_v32  ;;  %v1438_v43 = vrot.slane %v1396_v60, 1  ;;  %v1371_v32 = vrot.slane %v3981_v46, 2  ;;  %v1463_v8 = vld [vmem:[#allocation2 + $0x52] sm:$0x1] }
 0x241   :  { %v1840_v31 = vsel %vm1363_vm9, %v1839_v52, %v1838_v7  ;;  %v4107_v33 = vsel %vm1341_vm7, %v1756_v19, %v1755_v27  ;;  %v2332_v52 = vrot.slane %v3943_v6, 7  ;;  %v2292_v7 = vrot.slane %v3914_v30, 1 }
 0x242   :  { %2110 = vrot.lane.b32.xlu1 %v4042_v14, %s3486_s8  ;;  %1761 = vst.msk [vmem:[#allocation3 + $0x38] sm:$0xf] %vm1386_vm11, %v4107_v33  ;;  %v1411_v6 = vrot.slane %v1394_v42, 7  ;;  %v2336_v19 = vrot.slane %v3949_v53, 5  ;;  %v1415_v53 = vrot.slane %v1396_v60, 5  ;;  %v1373_v46 = vrot.slane %v3984_v49, 1 }
 0x243   :  { %1886 = vrot.lane.b32.xlu0 %v3892_v17, %s3485_s30  ;;  %v2011_v17 = vsel %vm1341_vm7, %v2010_v35, %v2009_v16  ;;  %v2162_v35 = vrot.slane %v4026_v24, 2  ;;  %v1842_v16 = vsel %vm1366_vm10, %v1841_v13, %v1840_v31  ;;  %v2099_v24 = vsel %vm1366_vm10, %v2098_v23, %v2097_v4 }
 0x244   :  { %1847 = vst.msk [vmem:[#allocation3 + $0x38] sm:$0xf0] %vm1845_vm12, %v1842_v16  ;;  %v2291_v13 = vsel %vm1363_vm9, %v2290_v5, %v2289_v58  ;;  %v2333_v39 = vsel %vm1335_vm5, %v2332_v52, %v3932_v62  ;;  %v1412_v23 = vsel %vm1335_vm5, %v1411_v6, %v1393_v54  ;;  %v1817_v4 = vrot.slane %v4057_v47, 6  ;;  %v1464_v58 = vld [vmem:[#allocation2 + $0x62] sm:$0x1] }
 0x245   :  { %v2163_v41 = vsel %vm1363_vm9, %v2162_v35, %v2161_v40  ;;  %v2293_v30 = vsel %vm1366_vm10, %v2292_v7, %v2291_v13  ;;  %v2335_v62 = vsel %vm1338_vm6, %v2334_v48, %v2333_v39  ;;  %v1435_v35 = vsel %vm1360_vm8, %v1434_v61, %v1433_v25  ;;  %v4202_v7 = vld [vmem:[#allocation2 + $0x54] sm:$0x1]  ;;  %v4212_v54 = vld [vmem:[#allocation2 + $0x64] sm:$0x1] }
 0x246   :  { %2014 = vrot.lane.b32.xlu1 %v2011_v17, %s3487_s9  ;;  %v2165_v11 = vsel %vm1366_vm10, %v2164_v50, %v2163_v41  ;;  %v1368_v16 = vrot.slane %v3990_v51, 4  ;;  %v1818_v44 = vsel %vm1338_vm6, %v1817_v4, %v1816_v10  ;;  %v1437_v51 = vsel %vm1363_vm9, %v1436_v20, %v1435_v35  ;;  %v4224_v61 = vld [vmem:[#allocation2 + $0x74] sm:$0x1] }
 0x247   :  { %2044 = vrot.lane.b32.xlu0 %v2011_v17, %s3485_s30  ;;  %v2227_v17 = vsel %vm1360_vm8, %v2226_v28, %v2225_v38  ;;  %v4168_v28 = vld [vmem:[#allocation2 + $0x53] sm:$0x1]  ;;  %vm4525_vm11 = vcmask 786052   ;;  %vm1423_vm12 = vcmask 519552   ;;  %v1480_v52 = vrot.slane %v1463_v8, 7 }
 0x248   :  { %v1370_v50 = vsel %vm1360_vm8, %v1369_v37, %v1368_v16  ;;  %v1548_v41 = vrot.slane %v4168_v28, 7  ;;  %v1482_v6 = vrot.slane %v1464_v58, 6  ;;  %v1571_v20 = vrot.slane %v4168_v28, 3  ;;  %v1667_v16 = vld [vmem:[#allocation2 + $0x55] sm:$0x1] }
 0x249   :  { %v1620_v37 = vrot.slane %v4224_v61, 5  ;;  %v1573_v28 = vrot.slane %v4180_v57, 2 }
 0x24a   :  { %2176 = vrot.lane.b32.xlu1 %v2143_v21, %s3487_s9 }
 0x24b   :  { %2036 = vrot.lane.b32.xlu0 %v2033_v26, %s3486_s8 }
 0x24e   :  { %2080 = vrot.lane.b32.xlu1 %v4042_v14, %s3488_s10  ;;  %v2229_v14 = vsel %vm1363_vm9, %v2228_v22, %v2227_v17  ;;  %v4185_v17 = vld [vmem:[#allocation2 + $0x43] sm:$0x1] }
 0x24f   :  { %2102 = vrot.lane.b32.xlu0 %v2099_v24, %s3487_s9  ;;  %v2231_v36 = vsel %vm1366_vm10, %v2230_v29, %v2229_v14  ;;  %v1819_v24 = vrot.slane %v4073_v1, 5  ;;  %v4197_v29 = vld [vmem:[#allocation2 + $0x73] sm:$0x1]  ;;  %v1550_v14 = vrot.slane %v4180_v57, 6  ;;  %v1549_v5 = vsel %vm1335_vm5, %v1548_v41, %v4185_v17 }
 0x250   :  { %v1552_v48 = vrot.slane %v4197_v29, 5 }
 0x251   :  { %v4189_v3 = vsel %vm1341_vm7, %v1819_v24, %v1818_v44  ;;  %v1551_v39 = vsel %vm1338_vm6, %v1550_v14, %v1549_v5  ;;  %v1668_v44 = vld [vmem:[#allocation2 + $0x65] sm:$0x1]  ;;  %v1641_v14 = vrot.slane %v4212_v54, 2 }
 0x252   :  { %2242 = vrot.lane.b32.xlu1 %v2209_v63, %s3488_s10 }
 0x253   :  { %2168 = vrot.lane.b32.xlu0 %v2165_v11, %s3488_s10  ;;  %v1372_v11 = vsel %vm1363_vm9, %v1371_v32, %v1370_v50  ;;  %v1639_v32 = vrot.slane %v4202_v7, 3 }
 0x254   :  { %v1374_v13 = vsel %vm1366_vm10, %v1373_v46, %v1372_v11  ;;  %v1669_v46 = vld [vmem:[#allocation2 + $0x75] sm:$0x1]  ;;  %v1686_v11 = vrot.slane %v1668_v44, 6 }
 0x256   :  { %2146 = vrot.lane.b32.xlu1 %v2143_v21, %s3489_s13  ;;  %v1413_v21 = vrot.slane %v1395_v45, 6  ;;  %v1465_v45 = vld [vmem:[#allocation2 + $0x72] sm:$0x1] }
 0x257   :  { %2234 = vrot.lane.b32.xlu0 %v2231_v36, %s3489_s13  ;;  %v1462_v36 = vld [vmem:[#allocation2 + $0x42] sm:$0x1]  ;;  %v1484_v25 = vrot.slane %v1465_v45, 5 }
 0x258   :  { %v1977_v15 = vpop.permute.xlu1 %1976  ;;  %v1414_v31 = vsel %vm1338_vm6, %v1413_v21, %v1412_v23  ;;  %v1598_v21 = vld [vmem:[#allocation2 + $0x44] sm:$0x1]  ;;  %v1553_v23 = vsel %vm1341_vm7, %v1552_v48, %v1551_v39 }
 0x259   :  { %v1907_v55 = vpop.permute.xlu0 %1906  ;;  %1982 = vst.msk [vmem:[#allocation3 + $0x20] sm:$0xf] %vm1455_vm15, %v1977_v15  ;;  %v1416_v47 = vsel %vm1341_vm7, %v1415_v53, %v1414_v31  ;;  %v1481_v15 = vsel %vm1335_vm5, %v1480_v52, %v1462_v36  ;;  %v1570_v53 = vrot.slane %v4185_v17, 4  ;;  %v1638_v24 = vrot.slane %v1598_v21, 4 }
 0x25a   :  { %1912 = vst.msk [vmem:[#allocation3 + $0x8] sm:$0xf0] %vm1381_vm0, %v1907_v55  ;;  %2304 = vrot.lane.b32.xlu1 %v3941_v12, %s3489_s13  ;;  %v2337_v12 = vsel %vm1341_vm7, %v2336_v19, %v2335_v62  ;;  %v1502_v55 = vrot.slane %v1462_v36, 4  ;;  %v1503_v19 = vrot.slane %v1463_v8, 3  ;;  %v1483_v56 = vsel %vm1338_vm6, %v1482_v6, %v1481_v15 }
 0x25b   :  { %2296 = vrot.lane.b32.xlu0 %v2293_v30, %s3490_s14  ;;  %v1616_v30 = vrot.slane %v4202_v7, 7  ;;  %v1640_v52 = vsel %vm1360_vm8, %v1639_v32, %v1638_v24  ;;  %v1688_v7 = vrot.slane %v1669_v46, 5 }
 0x25c   :  { %v4155_v27 = vpop.permute.xlu1 %1884  ;;  %v1504_v4 = vsel %vm1360_vm8, %v1503_v19, %v1502_v55  ;;  %v1642_v39 = vsel %vm1363_vm9, %v1641_v14, %v1640_v52  ;;  %v1711_v19 = vrot.slane %v1669_v46, 1 }
 0x25d   :  { %v1969_v26 = vpop.permute.xlu0 %1968  ;;  %v1617_v31 = vsel %vm1335_vm5, %v1616_v30, %v1598_v21 }
 0x25e   :  { %1974 = vst.msk [vmem:[#allocation3 + $0x8] sm:$0xf0] %vm1446_vm1, %v1969_v26  ;;  %2212 = vrot.lane.b32.xlu1 %v2209_v63, %s3490_s14  ;;  %v1439_v63 = vsel %vm1366_vm10, %v1438_v43, %v1437_v51  ;;  %v1618_v26 = vrot.slane %v4212_v54, 6  ;;  %v1572_v43 = vsel %vm1360_vm8, %v1571_v20, %v1570_v53  ;;  %v1684_v51 = vrot.slane %v1667_v16, 7 }
 0x25f   :  { %2366 = vrot.lane.b32.xlu0 %v2337_v12, %s3490_s14  ;;  %v1574_v57 = vsel %vm1363_vm9, %v1573_v28, %v1572_v43 }
 0x260   :  { %v2043_v40 = vpop.permute.xlu1 %2042 }
 0x261   :  { %v2035_v38 = vpop.permute.xlu0 %2034  ;;  %2048 = vst.msk [vmem:[#allocation3 + $0x20] sm:$0xf] %vm1355_vm3, %v2043_v40  ;;  %v1619_v40 = vsel %vm1338_vm6, %v1618_v26, %v1617_v31  ;;  %v1774_v26 = vrot.slane %v4075_v34, 1 }
 0x262   :  { %2040 = vst.msk [vmem:[#allocation3 + $0x8] sm:$0xf0] %vm4527_vm2, %v2035_v38  ;;  %2340 = vrot.lane.b32.xlu1 %v2337_v12, %s3484_s2  ;;  %v1505_v12 = vrot.slane %v1464_v58, 2  ;;  %v1507_v38 = vrot.slane %v1465_v45, 1  ;;  %v1621_v17 = vsel %vm1341_vm7, %v1620_v37, %v1619_v40  ;;  %v1709_v45 = vrot.slane %v1668_v44, 2 }
 0x263   :  { %1451 = vrot.lane.b32.xlu0 %v1416_v47, %s3484_s2  ;;  %vm1782_vm2 = vcmask 1048452  }
 0x264   :  { %v4183_v1 = vpop.permute.xlu1 %1946 }
 0x265   :  { %v2101_v22 = vpop.permute.xlu0 %2100 }
 0x266   :  { %2106 = vst.msk [vmem:[#allocation3 + $0x8] sm:$0xf0] %vm4526_vm4, %v2101_v22  ;;  %1823 = vrot.lane.b32.xlu1 %v4189_v3, %s3484_s2  ;;  %v1666_v22 = vld [vmem:[#allocation2 + $0x45] sm:$0x1]  ;;  %vm1696_vm4 = vcmask 1044352  }
 0x267   :  { %1442 = vrot.lane.b32.xlu0 %v1439_v63, %s3485_s30  ;;  %v1575_v63 = vrot.slane %v4197_v29, 1  ;;  %v1685_v5 = vsel %vm1335_vm5, %v1684_v51, %v1666_v22  ;;  %v1706_v58 = vrot.slane %v1666_v22, 4  ;;  %vm1719_vm5 = vcmask 917252  }
 0x268   :  { %v2109_v49 = vpop.permute.xlu1 %2108  ;;  %v1687_v48 = vsel %vm1338_vm6, %v1686_v11, %v1685_v5  ;;  %vm4528_vm6 = vcmask 523652  }
 0x269   :  { %v2167_v42 = vpop.permute.xlu0 %2166  ;;  %2114 = vst.msk [vmem:[#allocation3 + $0x20] sm:$0xf] %vm1423_vm12, %v2109_v49  ;;  %v1576_v36 = vsel %vm1366_vm10, %v1575_v63, %v1574_v57  ;;  %v1689_v54 = vsel %vm1341_vm7, %v1688_v7, %v1687_v48 }
 0x26a   :  { %2172 = vst.msk [vmem:[#allocation3 + $0x8] sm:$0xf0] %vm4525_vm11, %v2167_v42  ;;  %1377 = vrot.lane.b32.xlu1 %v1374_v13, %s3484_s2  ;;  %vm1628_vm11 = vcmask 913152   ;;  %v1707_v42 = vrot.slane %v1667_v16, 3  ;;  %v1643_v13 = vrot.slane %v4224_v61, 1 }
 0x26b   :  { %1419 = vrot.lane.b32.xlu0 %v1416_v47, %s3486_s8  ;;  %v1506_v47 = vsel %vm1363_vm9, %v1505_v12, %v1504_v4  ;;  %v2410_v4 = vld [vmem:[#allocation3 + $0x28] sm:$0xf] }
 0x26c   :  { %v4217_v60 = vpop.permute.xlu1 %2012  ;;  %v1508_v8 = vsel %vm1366_vm10, %v1507_v38, %v1506_v47  ;;  %v1708_v6 = vsel %vm1360_vm8, %v1707_v42, %v1706_v58  ;;  %v1644_v30 = vsel %vm1366_vm10, %v1643_v13, %v1642_v39 }
 0x26d   :  { %v4215_v62 = vpop.permute.xlu0 %2144  ;;  %v1710_v21 = vsel %vm1363_vm9, %v1709_v45, %v1708_v6 }
 0x26e   :  { %1351 = vrot.lane.b32.xlu1 %v4018_v18, %s3485_s30  ;;  %v1485_v18 = vsel %vm1341_vm7, %v1484_v25, %v1483_v56  ;;  %v1770_v25 = vrot.slane %v4065_v59, 3  ;;  %v1772_v59 = vrot.slane %v4067_v2, 2  ;;  %vm4529_vm7 = vcmask 654852  }
 0x26f   :  { %1588 = vrot.lane.b32.xlu0 %v1553_v23, %s3486_s8 }
 0x270   :  { %v2175_v35 = vpop.permute.xlu1 %2174 }
 0x271   :  { %v2303_v10 = vpop.permute.xlu0 %2302  ;;  %2180 = vst.msk [vmem:[#allocation3 + $0x20] sm:$0xf] %vm1492_vm13, %v2175_v35 }
 0x272   :  { %1520 = vrot.lane.b32.xlu1 %v1485_v18, %s3485_s30 }
 0x273   :  { %1488 = vrot.lane.b32.xlu0 %v1485_v18, %s3487_s9 }
 0x274   :  { %v2079_v41 = vpop.permute.xlu1 %2078 }
 0x275   :  { %v2295_v50 = vpop.permute.xlu0 %2294 }
 0x276   :  { %1511 = vrot.lane.b32.xlu1 %v1508_v8, %s3486_s8 }
 0x277   :  { %1656 = vrot.lane.b32.xlu0 %v1621_v17, %s3487_s9 }
 0x278   :  { %v2241_v29 = vpop.permute.xlu1 %2240 }
 0x279   :  { %v2365_v49 = vpop.permute.xlu0 %2364  ;;  %2246 = vst.msk [vmem:[#allocation3 + $0x20] sm:$0xf] %vm1560_vm14, %v2241_v29 }
 0x27a   :  { %2308 = vst.msk [vmem:[#allocation3 + $0x20] sm:$0xf] %vm1628_vm11, %v2303_v10  ;;  %1579 = vrot.lane.b32.xlu1 %v1576_v36, %s3487_s9 }
 0x27b   :  { %1556 = vrot.lane.b32.xlu0 %v1553_v23, %s3488_s10  ;;  %2370 = vst.msk [vmem:[#allocation3 + $0x20] sm:$0xf] %vm1696_vm4, %v2365_v49  ;;  %v1769_v23 = vrot.slane %v4080_v9, 4 }
 0x27c   :  { %v2233_v15 = vpop.permute.xlu1 %2232 }
 0x27d   :  { %v1822_v55 = vpop.permute.xlu0 %1821  ;;  %2238 = vst.msk [vmem:[#allocation3 + $0x8] sm:$0xf0] %vm1719_vm5, %v2233_v15  ;;  %v1771_v9 = vsel %vm1360_vm8, %v1770_v25, %v1769_v23  ;;  %vm4530_vm8 = vcmask 786052  }
 0x27e   :  { %1827 = vst.msk [vmem:[#allocation3 + $0x8] sm:$0xf] %vm1455_vm15, %v1822_v55  ;;  %1647 = vrot.lane.b32.xlu1 %v1644_v30, %s3488_s10 }
 0x27f   :  { %2300 = vst.msk [vmem:[#allocation3 + $0x8] sm:$0xf0] %vm1782_vm2, %v2295_v50  ;;  %1724 = vrot.lane.b32.xlu0 %v1689_v54, %s3488_s10 }
 0x280   :  { %1890 = vst.msk [vmem:[#allocation3 + $0x8] sm:$0xf] %vm1355_vm3, %v4155_v27  ;;  %v2211_v56 = vpop.permute.xlu1 %2210  ;;  %v1712_v27 = vsel %vm1366_vm10, %v1711_v19, %v1710_v21  ;;  %v2758_v19 = vld [vmem:[#allocation3 + $0x58] sm:$0xf] }
 0x281   :  { %1952 = vst.msk [vmem:[#allocation3 + $0x8] sm:$0xf] %vm1423_vm12, %v4183_v1  ;;  %v1450_v61 = vpop.permute.xlu0 %1449 }
 0x282   :  { %2018 = vst.msk [vmem:[#allocation3 + $0x8] sm:$0xf] %vm1492_vm13, %v4217_v60  ;;  %1715 = vrot.lane.b32.xlu1 %v1712_v27, %s3489_s13  ;;  %v2409_v31 = vld [vmem:[#allocation3 + $0x20] sm:$0xf] }
 0x283   :  { %2084 = vst.msk [vmem:[#allocation3 + $0x8] sm:$0xf] %vm1560_vm14, %v2079_v41  ;;  %1624 = vrot.lane.b32.xlu0 %v1621_v17, %s3489_s13  ;;  %v3319_v20 = vpack.i.bf16 %v2410_v4, %v2409_v31 }
 0x284   :  { %1456 = vst.msk [vmem:[#allocation3 + $0x18] sm:$0xf] %vm1455_vm15, %v1450_v61  ;;  %v2339_v1 = vpop.permute.xlu1 %2338 }
 0x285   :  { %2150 = vst.msk [vmem:[#allocation3 + $0x8] sm:$0xf] %vm1628_vm11, %v4215_v62  ;;  %v1350_v60 = vpop.permute.xlu0 %1349  ;;  %v1773_v62 = vsel %vm1363_vm9, %v1772_v59, %v1771_v9  ;;  %vm4531_vm9 = vmmov %vm4528_vm6 }
 0x286   :  { %2216 = vst.msk [vmem:[#allocation3 + $0x8] sm:$0xf] %vm1696_vm4, %v2211_v56  ;;  %1692 = vrot.lane.b32.xlu1 %v1689_v54, %s3490_s14  ;;  %v1775_v53 = vsel %vm1366_vm10, %v1774_v26, %v1773_v62  ;;  %vm4532_vm10 = vmmov %vm4529_vm7 }
 0x287   :  { %2344 = vst.msk [vmem:[#allocation3 + $0x10] sm:$0xf] %vm1455_vm15, %v2339_v1  ;;  %1787 = vrot.lane.b32.xlu0 %v4107_v33, %s3489_s13 }
 0x288   :  { %1356 = vst.msk [vmem:[#allocation3] sm:$0xf] %vm1355_vm3, %v1350_v60  ;;  %v1376_v2 = vpop.permute.xlu1 %1375 }
 0x289   :  { %v1519_v12 = vpop.permute.xlu0 %1518  ;;  %1382 = vst.msk [vmem:[#allocation3] sm:$0xf0] %vm1381_vm0, %v1376_v2 }
 0x28a   :  { %1524 = vst.msk [vmem:[#allocation3 + $0x18] sm:$0xf] %vm1355_vm3, %v1519_v12  ;;  %1850 = vrot.lane.b32.xlu1 %v4189_v3, %s3490_s14 }
 0x28b   :  { %1778 = vrot.lane.b32.xlu0 %v1775_v53, %s3490_s14 }
 0x28c   :  { %v1441_v34 = vpop.permute.xlu1 %1440 }
 0x28d   :  { %v1418_v33 = vpop.permute.xlu0 %1417  ;;  %1447 = vst.msk [vmem:[#allocation3] sm:$0xf0] %vm1446_vm1, %v1441_v34  ;;  %v2406_v35 = vld [vmem:[#allocation3 + $0x8] sm:$0xff] }
 0x28e   :  { %1424 = vst.msk [vmem:[#allocation3] sm:$0xf] %vm1423_vm12, %v1418_v33  ;;  %v2407_v10 = vld [vmem:[#allocation3 + $0x10] sm:$0xff]  ;;  %3315 = vrot.lane.b32.xlu1 %v3319_v20, %s3491_s15 }
 0x28f   :  { %3320 = vrot.lane.b32.xlu0 %v3319_v20, %s3490_s14  ;;  %v3329_v37 = vpack.i.bf16 %v2407_v10, %v2406_v35 }
 0x290   :  { %v1510_v16 = vpop.permute.xlu1 %1509 }
 0x291   :  { %v1587_v18 = vpop.permute.xlu0 %1586  ;;  %1516 = vst.msk [vmem:[#allocation3] sm:$0xf0] %vm4528_vm6, %v1510_v16  ;;  %vm4533_vm6 = vmmov %vm4530_vm8 }
 0x292   :  { %1592 = vst.msk [vmem:[#allocation3 + $0x18] sm:$0xf] %vm1423_vm12, %v1587_v18  ;;  %3325 = vrot.lane.b32.xlu1 %v3319_v20, %s3492_s16 }
 0x293   :  { %3330 = vrot.lane.b32.xlu0 %v3329_v37, %s3491_s15 }
 0x294   :  { %v1578_v3 = vpop.permute.xlu1 %1577 }
 0x295   :  { %v1487_v38 = vpop.permute.xlu0 %1486  ;;  %1584 = vst.msk [vmem:[#allocation3] sm:$0xf0] %vm4529_vm7, %v1578_v3 }
 0x296   :  { %1493 = vst.msk [vmem:[#allocation3] sm:$0xf] %vm1492_vm13, %v1487_v38  ;;  %3340 = vrot.lane.b32.xlu1 %v3329_v37, %s3490_s14 }
 0x298   :  { %v1646_v40 = vpop.permute.xlu1 %1645 }
 0x299   :  { %v1655_v47 = vpop.permute.xlu0 %1654  ;;  %1652 = vst.msk [vmem:[#allocation3] sm:$0xf0] %vm4530_vm8, %v1646_v40 }
 0x29a   :  { %1660 = vst.msk [vmem:[#allocation3 + $0x18] sm:$0xf] %vm1492_vm13, %v1655_v47 }
 0x29c   :  { %v1623_v28 = vpop.permute.xlu1 %1622 }
 0x29d   :  { %v1555_v24 = vpop.permute.xlu0 %1554 }
 0x29e   :  { %1561 = vst.msk [vmem:[#allocation3] sm:$0xf] %vm1560_vm14, %v1555_v24 }
 0x29f   :  { %1629 = vst.msk [vmem:[#allocation3] sm:$0xf] %vm1628_vm11, %v1623_v28 }
 0x2a0   :  { %v1786_v43 = vpop.permute.xlu1 %1785 }
 0x2a1   :  { %v1723_v44 = vpop.permute.xlu0 %1722 }
 0x2a2   :  { %1728 = vst.msk [vmem:[#allocation3 + $0x18] sm:$0xf] %vm1560_vm14, %v1723_v44 }
 0x2a3   :  { %1791 = vst.msk [vmem:[#allocation3 + $0x18] sm:$0xf] %vm1628_vm11, %v1786_v43 }
 0x2a4   :  { %v1777_v51 = vpop.permute.xlu1 %1776 }
 0x2a5   :  { %v1714_v32 = vpop.permute.xlu0 %1713 }
 0x2a6   :  { %1720 = vst.msk [vmem:[#allocation3] sm:$0xf0] %vm1719_vm5, %v1714_v32 }
 0x2a7   :  { %1783 = vst.msk [vmem:[#allocation3] sm:$0xf0] %vm1782_vm2, %v1777_v51 }
 0x2a8   :  { %v1979_v41 = vpop.permute.xlu1 %1978 }
 0x2a9   :  { %v1691_v50 = vpop.permute.xlu0 %1690  ;;  %1983 = vst.msk [vmem:[#allocation3 + $0x50] sm:$0xf] %vm1455_vm15, %v1979_v41 }
 0x2aa   :  { %1697 = vst.msk [vmem:[#allocation3] sm:$0xf] %vm1696_vm4, %v1691_v50 }
 0x2ac   :  { %v1971_v17 = vpop.permute.xlu1 %1970 }
 0x2ad   :  { %v1849_v22 = vpop.permute.xlu0 %1848 }
 0x2ae   :  { %1854 = vst.msk [vmem:[#allocation3 + $0x18] sm:$0xf] %vm1696_vm4, %v1849_v22 }
 0x2b0   :  { %v1949_v8 = vpop.permute.xlu1 %1948 }
 0x2b1   :  { %v1909_v63 = vpop.permute.xlu0 %1908  ;;  %v2405_v11 = vld [vmem:[#allocation3] sm:$0xff] }
 0x2b2   :  { %1913 = vst.msk [vmem:[#allocation3 + $0x38] sm:$0xf0] %vm1381_vm0, %v1909_v63 }
 0x2b3   :  { %1975 = vst.msk [vmem:[#allocation3 + $0x38] sm:$0xf0] %vm1446_vm1, %v1971_v17 }
 0x2b4   :  { %v2111_v57 = vpop.permute.xlu1 %2110 }
 0x2b5   :  { %v1887_v46 = vpop.permute.xlu0 %1886  ;;  %v2408_v14 = vld [vmem:[#allocation3 + $0x18] sm:$0xf] }
 0x2b6   :  { %v3334_v5 = vpack.i.bf16 %v2408_v14, %v2405_v11 }
 0x2b8   :  { %3335 = vrot.lane.b32.xlu0 %v3334_v5, %s3491_s15  ;;  %3345 = vrot.lane.b32.xlu1 %v3334_v5, %s3490_s14  ;;  %v2015_v58 = vpop.permute.xlu1 %2014 }
 0x2b9   :  { %v2045_v52 = vpop.permute.xlu0 %2044 }
 0x2ba   :  { %2049 = vst.msk [vmem:[#allocation3 + $0x50] sm:$0xf] %vm1355_vm3, %v2045_v52 }
 0x2bb   :  { %2115 = vst.msk [vmem:[#allocation3 + $0x50] sm:$0xf] %vm1423_vm12, %v2111_v57 }
 0x2bc   :  { %3350 = vrot.lane.b32.xlu0 %v3329_v37, %s3492_s16  ;;  %v2177_v42 = vpop.permute.xlu1 %2176 }
 0x2bd   :  { %v2037_v49 = vpop.permute.xlu0 %2036  ;;  %2181 = vst.msk [vmem:[#allocation3 + $0x50] sm:$0xf] %vm1492_vm13, %v2177_v42  ;;  %v3494_v42 = vmov 0  }
 0x2be   :  { %2041 = vst.msk [vmem:[#allocation3 + $0x38] sm:$0xf0] %vm4531_vm9, %v2037_v49  ;;  %3404 = vset.pattern.permute.xlu0 %v3494_v42  ;;  %v2403_v49 = vld [vmem:[%s4522_s5] sm:$0xf]  ;;  %3405 = vset.pattern.permute.xlu1 %v3494_v42 }
 0x2c0   :  { %3355 = vrot.lane.b32.xlu0 %v3334_v5, %s3492_s16  ;;  %v2081_v29 = vpop.permute.xlu1 %2080 }
 0x2c1   :  { %v2103_v36 = vpop.permute.xlu0 %2102 }
 0x2c2   :  { %2107 = vst.msk [vmem:[#allocation3 + $0x38] sm:$0xf0] %vm4532_vm10, %v2103_v36 }
 0x2c4   :  { %v2243_v7 = vpop.permute.xlu1 %2242 }
 0x2c5   :  { %v2169_v13 = vpop.permute.xlu0 %2168  ;;  %2247 = vst.msk [vmem:[#allocation3 + $0x50] sm:$0xf] %vm1560_vm14, %v2243_v7 }
 0x2c6   :  { %2173 = vst.msk [vmem:[#allocation3 + $0x38] sm:$0xf0] %vm4533_vm6, %v2169_v13 }
 0x2c8   :  { %v2147_v48 = vpop.permute.xlu1 %2146 }
 0x2c9   :  { %v2235_v39 = vpop.permute.xlu0 %2234 }
 0x2ca   :  { %2239 = vst.msk [vmem:[#allocation3 + $0x38] sm:$0xf0] %vm1719_vm5, %v2235_v39 }
 0x2cc   :  { %v2305_v45 = vpop.permute.xlu1 %2304 }
 0x2cd   :  { %v2297_v6 = vpop.permute.xlu0 %2296  ;;  %2309 = vst.msk [vmem:[#allocation3 + $0x50] sm:$0xf] %vm1628_vm11, %v2305_v45 }
 0x2ce   :  { %2301 = vst.msk [vmem:[#allocation3 + $0x38] sm:$0xf0] %vm1782_vm2, %v2297_v6 }
 0x2d0   :  { %v2213_v15 = vpop.permute.xlu1 %2212 }
 0x2d1   :  { %v2367_v55 = vpop.permute.xlu0 %2366 }
 0x2d2   :  { %2371 = vst.msk [vmem:[#allocation3 + $0x50] sm:$0xf] %vm1696_vm4, %v2367_v55 }
 0x2d4   :  { %v2341_v54 = vpop.permute.xlu1 %2340 }
 0x2d5   :  { %v1452_v30 = vpop.permute.xlu0 %1451  ;;  %2345 = vst.msk [vmem:[#allocation3 + $0x40] sm:$0xf] %vm1455_vm15, %v2341_v54 }
 0x2d6   :  { %1457 = vst.msk [vmem:[#allocation3 + $0x48] sm:$0xf] %vm1455_vm15, %v1452_v30 }
 0x2d8   :  { %v1824_v21 = vpop.permute.xlu1 %1823 }
 0x2d9   :  { %v1443_v23 = vpop.permute.xlu0 %1442  ;;  %v2757_v25 = vld [vmem:[#allocation3 + $0x50] sm:$0xf]  ;;  %1828 = vst.msk [vmem:[#allocation3 + $0x38] sm:$0xf] %vm1455_vm15, %v1824_v21  ;;  %vm4534_vm15 = vmmov %vm4531_vm9 }
 0x2da   :  { %v4341_v56 = vpack.i.bf16 %v2758_v19, %v2757_v25  ;;  %1891 = vst.msk [vmem:[#allocation3 + $0x38] sm:$0xf] %vm1355_vm3, %v1887_v46 }
 0x2db   :  { %1953 = vst.msk [vmem:[#allocation3 + $0x38] sm:$0xf] %vm1423_vm12, %v1949_v8 }
 0x2dc   :  { %3360 = vrot.lane.b32.xlu0 %v4341_v56, %s3491_s15  ;;  %3365 = vrot.lane.b32.xlu1 %v4341_v56, %s3490_s14  ;;  %2019 = vst.msk [vmem:[#allocation3 + $0x38] sm:$0xf] %vm1492_vm13, %v2015_v58  ;;  %v1378_v27 = vpop.permute.xlu1 %1377  ;;  %v2755_v62 = vld [vmem:[#allocation3 + $0x40] sm:$0xff] }
 0x2dd   :  { %v1420_v61 = vpop.permute.xlu0 %1419  ;;  %2085 = vst.msk [vmem:[#allocation3 + $0x38] sm:$0xf] %vm1560_vm14, %v2081_v29  ;;  %v2404_v29 = vld [vmem:[%s4523_s6] sm:$0xf] }
 0x2de   :  { %1383 = vst.msk [vmem:[#allocation3 + $0x30] sm:$0xf0] %vm1381_vm0, %v1378_v27  ;;  %vm4535_vm0 = vmmov %vm4529_vm7  ;;  %v2411_v27 = vld [vmem:[%s4521_s4] sm:$0xf] }
 0x2df   :  { %2151 = vst.msk [vmem:[#allocation3 + $0x38] sm:$0xf] %vm1628_vm11, %v2147_v48 }
 0x2e0   :  { %1448 = vst.msk [vmem:[#allocation3 + $0x30] sm:$0xf0] %vm1446_vm1, %v1443_v23  ;;  %v1352_v9 = vpop.permute.xlu1 %1351  ;;  %vm4536_vm1 = vmmov %vm4533_vm6 }
 0x2e1   :  { %2217 = vst.msk [vmem:[#allocation3 + $0x38] sm:$0xf] %vm1696_vm4, %v2213_v15  ;;  %v1589_v59 = vpop.permute.xlu0 %1588 }
 0x2e2   :  { %1357 = vst.msk [vmem:[#allocation3 + $0x30] sm:$0xf] %vm1355_vm3, %v1352_v9 }
 0x2e3   :  { %1425 = vst.msk [vmem:[#allocation3 + $0x30] sm:$0xf] %vm1423_vm12, %v1420_v61 }
 0x2e4   :  { %v1521_v60 = vpop.permute.xlu1 %1520 }
 0x2e5   :  { %v1489_v1 = vpop.permute.xlu0 %1488  ;;  %1525 = vst.msk [vmem:[#allocation3 + $0x48] sm:$0xf] %vm1355_vm3, %v1521_v60  ;;  %vm2430_vm3 = vcmask 924672  }
 0x2e6   :  { %1494 = vst.msk [vmem:[#allocation3 + $0x30] sm:$0xf] %vm1492_vm13, %v1489_v1 }
 0x2e7   :  { %1593 = vst.msk [vmem:[#allocation3 + $0x48] sm:$0xf] %vm1423_vm12, %v1589_v59  ;;  %vm2441_vm12 = vcmask 1043456   ;;  %v3121_v59 = vld [vmem:[%s4521_s4 + $0x4] sm:$0xf] }
 0x2e8   :  { %v2754_v26 = vld [vmem:[#allocation3 + $0x38] sm:$0xff]  ;;  %v1512_v53 = vpop.permute.xlu1 %1511 }
 0x2e9   :  { %v3379_v2 = vpack.i.bf16 %v2755_v62, %v2754_v26  ;;  %v1657_v12 = vpop.permute.xlu0 %1656  ;;  %1517 = vst.msk [vmem:[#allocation3 + $0x30] sm:$0xf0] %vm4534_vm15, %v1512_v53 }
 0x2ea   :  { %1661 = vst.msk [vmem:[#allocation3 + $0x48] sm:$0xf] %vm1492_vm13, %v1657_v12  ;;  %vm2638_vm13 = vcmask 908288  }
 0x2eb   :  { %3380 = vrot.lane.b32.xlu0 %v3379_v2, %s3490_s14  ;;  %3370 = vrot.lane.b32.xlu1 %v3379_v2, %s3491_s15 }
 0x2ec   :  { %v1580_v4 = vpop.permute.xlu1 %1579 }
 0x2ed   :  { %v1557_v31 = vpop.permute.xlu0 %1556  ;;  %1585 = vst.msk [vmem:[#allocation3 + $0x30] sm:$0xf0] %vm4535_vm0, %v1580_v4  ;;  %v3125_v4 = vld [vmem:[%s4521_s4 + $0x8] sm:$0xf] }
 0x2ee   :  { %1562 = vst.msk [vmem:[#allocation3 + $0x30] sm:$0xf] %vm1560_vm14, %v1557_v31 }
 0x2f0   :  { %v1648_v33 = vpop.permute.xlu1 %1647 }
 0x2f1   :  { %v1725_v34 = vpop.permute.xlu0 %1724  ;;  %1653 = vst.msk [vmem:[#allocation3 + $0x30] sm:$0xf0] %vm4536_vm1, %v1648_v33 }
 0x2f2   :  { %1729 = vst.msk [vmem:[#allocation3 + $0x48] sm:$0xf] %vm1560_vm14, %v1725_v34  ;;  %vm2437_vm14 = vcmask 97280  }
 0x2f4   :  { %v1716_v10 = vpop.permute.xlu1 %1715 }
 0x2f5   :  { %v1625_v20 = vpop.permute.xlu0 %1624  ;;  %1721 = vst.msk [vmem:[#allocation3 + $0x30] sm:$0xf0] %vm1719_vm5, %v1716_v10 }
 0x2f6   :  { %1630 = vst.msk [vmem:[#allocation3 + $0x30] sm:$0xf] %vm1628_vm11, %v1625_v20 }
 0x2f8   :  { %v1693_v16 = vpop.permute.xlu1 %1692 }
 0x2f9   :  { %v1788_v35 = vpop.permute.xlu0 %1787  ;;  %1698 = vst.msk [vmem:[#allocation3 + $0x30] sm:$0xf] %vm1696_vm4, %v1693_v16 }
 0x2fa   :  { %1792 = vst.msk [vmem:[#allocation3 + $0x48] sm:$0xf] %vm1628_vm11, %v1788_v35  ;;  %vm2537_vm11 = vcmask 916480  }
 0x2fc   :  { %v1851_v37 = vpop.permute.xlu1 %1850 }
 0x2fd   :  { %v1779_v18 = vpop.permute.xlu0 %1778  ;;  %1855 = vst.msk [vmem:[#allocation3 + $0x48] sm:$0xf] %vm1696_vm4, %v1851_v37 }
 0x2fe   :  { %1784 = vst.msk [vmem:[#allocation3 + $0x30] sm:$0xf0] %vm1782_vm2, %v1779_v18  ;;  %vm3493_vm2 = vmmov 1  }
 0x2ff   :  { %vm4378_vm4 = vmpackc.low %vm2441_vm12, %vm3493_vm2 }
 0x300   :  { %v3316_v38 = vpop.permute.xlu1 %3315 }
 0x301   :  { %v3321_v3 = vpop.permute.xlu0 %3320  ;;  %v3318_v40 = vunpack.i.h.bf16 %v3316_v38  ;;  %v3317_v47 = vunpack.i.l.bf16 %v3316_v38 }
 0x302   :  { %v3323_v41 = vunpack.i.h.bf16 %v3321_v3  ;;  %v3322_v22 = vunpack.i.l.bf16 %v3321_v3 }
 0x303   :  { %v2434_v17 = vsel %vm2430_vm3, %v3317_v47, %v3318_v40 }
 0x304   :  { %v4374_v24 = vpop.permute.xlu1 %3325  ;;  %v2756_v44 = vld [vmem:[#allocation3 + $0x48] sm:$0xf]  ;;  %v2541_v5 = vsel %vm2537_vm11, %v3322_v22, %v3323_v41 }
 0x305   :  { %v3331_v28 = vpop.permute.xlu0 %3330  ;;  %v2753_v43 = vld [vmem:[#allocation3 + $0x30] sm:$0xff]  ;;  %v3328_v6 = vunpack.i.h.bf16 %v4374_v24  ;;  %v3327_v15 = vunpack.i.l.bf16 %v4374_v24 }
 0x306   :  { %v3333_v51 = vunpack.i.h.bf16 %v3331_v28  ;;  %v3332_v32 = vunpack.i.l.bf16 %v3331_v28  ;;  %v3384_v50 = vpack.i.bf16 %v2756_v44, %v2753_v43 }
 0x307   :  { %v2642_v9 = vsel %vm2638_vm13, %v3327_v15, %v3328_v6 }
 0x308   :  { %v2432_v8 = vsel %vm2430_vm3, %v3332_v32, %v3333_v51  ;;  %3385 = vrot.lane.b32.xlu0 %v3384_v50, %s3490_s14  ;;  %3375 = vrot.lane.b32.xlu1 %v3384_v50, %s3491_s15  ;;  %v3341_v46 = vpop.permute.xlu1 %3340 }
 0x309   :  { %v3260_v57 = vpack.c.bf16 %v2434_v17, %v2432_v8  ;;  %v3343_v11 = vunpack.i.h.bf16 %v3341_v46  ;;  %v3342_v14 = vunpack.i.l.bf16 %v3341_v46 }
 0x30b   :  { %3262 = vmatprep.subr.msk.bf16.mxu0 %vm4378_vm4, %v3260_v57  ;;  %v2539_v58 = vsel %vm2537_vm11, %v3342_v14, %v3343_v11 }
 0x30c   :  { %v3266_v52 = vpack.c.bf16 %v2541_v5, %v2539_v58  ;;  %3390 = vrot.lane.b32.xlu0 %v4341_v56, %s3492_s16  ;;  %3395 = vrot.lane.b32.xlu1 %v3379_v2, %s3492_s16 }
 0x30e   :  { %3268 = vmatprep.subr.msk.bf16.mxu1 %vm4378_vm4, %v3266_v52 }
 0x310   :  { %3400 = vrot.lane.b32.xlu1 %v3384_v50, %s3492_s16  ;;  %2733 = vperm.xlu0 %3404, %v2403_v49  }
 0x314   :  { %2740 = vperm.xlu1 %3405, %v2404_v29  }
 0x32a   :  { %v3336_v36 = vpop.permute.xlu0 %3335  ;;  %v3346_v7 = vpop.permute.xlu1 %3345 }
 0x32b   :  { %v3338_v13 = vunpack.i.h.bf16 %v3336_v36  ;;  %v3337_v48 = vunpack.i.l.bf16 %v3336_v36  ;;  %v3348_v39 = vunpack.i.h.bf16 %v3346_v7  ;;  %v3347_v45 = vunpack.i.l.bf16 %v3346_v7 }
 0x32d   :  { %v2431_v55 = vsel %vm2430_vm3, %v3337_v48, %v3332_v32  ;;  %v2433_v54 = vsel %vm2430_vm3, %v3338_v13, %v3317_v47  ;;  %v2540_v30 = vsel %vm2537_vm11, %v3348_v39, %v3322_v22  ;;  %v2538_v19 = vsel %vm2537_vm11, %v3347_v45, %v3342_v14  ;;  %v2759_v48 = vld [vmem:[%s4521_s4] sm:$0xf]  ;;  %v3132_v39 = vld [vmem:[%s4521_s4 + $0x4] sm:$0xf] }
 0x32e   :  { %v3263_v21 = vpack.c.bf16 %v2433_v54, %v2431_v55  ;;  %v3269_v23 = vpack.c.bf16 %v2540_v30, %v2538_v19  ;;  %v3351_v25 = vpop.permute.xlu0 %3350 }
 0x32f   :  { %v3353_v56 = vunpack.i.h.bf16 %v3351_v25  ;;  %v3352_v61 = vunpack.i.l.bf16 %v3351_v25  ;;  %v3136_v25 = vld [vmem:[%s4521_s4 + $0x8] sm:$0xf]  ;;  %s3495_s4 = smov [#allocation9]  }
 0x330   :  { %3265 = vmatpush1.bf16.msk.msra.mxu0 %vm4378_vm4, %v3263_v21  ;;  %3271 = vmatpush1.bf16.msk.msra.mxu1 %vm4378_vm4, %v3269_v23  ;;  %s3081_s28 = sshll.u32 %s3495_s4, 4  ;;  %s3082_s28 = int_to_ptr.vmem [resolvable:$true] %s3081_s28 }
 0x331   :  { %v2640_v1 = vsel %vm2638_vm13, %v3352_v61, %v3353_v56  ;;  %v2372_v56 = vlaneseq  ;;  %s3450_s29 = scalar_lea.vmem %s3082_s28, 256  ;;  %p3455_p3 = scmp.lt.s32.totalorder %s3082_s28, %s3082_s28 }
 0x332   :  { %v3272_v60 = vpack.c.bf16 %v2642_v9, %v2640_v1  ;;  %v3356_v26 = vpop.permute.xlu0 %3355  ;;  %p3451_p2 = scmp.ne.s32.totalorder %s3082_s28, %s3450_s29  ;;  %p3456_p4 = scmp.lt.s32.totalorder %s3450_s29, %s3450_s29 }
 0x333   :  { %v3358_v62 = vunpack.i.h.bf16 %v3356_v26  ;;  %v3357_v2 = vunpack.i.l.bf16 %v3356_v26  ;;  %3120 = vmatmul.mubr.msk.f32.vlgmr.msra.gmra.mrb[16].mxu0 %vm2437_vm14, %v2411_v27  ;;  %3124 = vmatmul.mubr.msk.f32.vlgmr.msra.gmra.mrb[16].mxu1 %vm2437_vm14, %v3121_v59 }
 0x334   :  { %3274 = vmatprep.subr.msk.bf16.mxu0 %vm4378_vm4, %v3272_v60  ;;  %2716 = vmatprep.mubr.f32.mxu0 %v3482_v0  ;;  %p3457_p5 = por %p3456_p4, %p3455_p3 }
 0x335   :  { %v2639_v12 = vsel %vm2638_vm13, %v3357_v2, %v3352_v61  ;;  %v2641_v53 = vsel %vm2638_vm13, %v3358_v62, %v3327_v15  ;;  %2855 = vmatprep.mubr.f32.mxu1 %v3482_v0  ;;  %v2373_v61 = vand.u32 127, %v2372_v56 }
 0x336   :  { %v3275_v31 = vpack.c.bf16 %v2641_v53, %v2639_v12  ;;  %p3458_p6 = pnand %p3457_p5, %p3451_p2 }
 0x337   :  { %v2374_v27 = vadd.s32 128, %v2373_v61  ;;  %v2379_v59 = vand.u32 15, %v2373_v61 }
 0x338   :  { %3277 = vmatpush1.bf16.msk.msra.mxu0 %vm4378_vm4, %v3275_v31 }
 0x339   :  { %v2386_v9 = vand.u32 15, %v2374_v27  ;;  %vm4470_vm5 = vcmp.gt.s32.totalorder %v2379_v59, 0  ;;  %vm4482_vm8 = vcmp.lt.s32.totalorder %v2379_v59, 15 }
 0x33b   :  { %3128 = vmatmul.mubr.msk.f32.vlgmr.msra.gmra.mrb[18].mxu0 %vm2437_vm14, %v3125_v4  ;;  %vm4474_vm7 = vcmp.gt.s32.totalorder %v2386_v9, 0  ;;  %vm4486_vm9 = vcmp.lt.s32.totalorder %v2386_v9, 15 }
 0x33c   :  { %2954 = vmatprep.mubr.f32.mxu0 %v3482_v0 }
 0x34e   :  { %v3361_v34 = vpop.permute.xlu0 %3360  ;;  %v3366_v33 = vpop.permute.xlu1 %3365 }
 0x34f   :  { %v3363_v20 = vunpack.i.h.bf16 %v3361_v34  ;;  %v3362_v10 = vunpack.i.l.bf16 %v3361_v34  ;;  %v3368_v35 = vunpack.i.h.bf16 %v3366_v33  ;;  %v3367_v16 = vunpack.i.l.bf16 %v3366_v33 }
 0x351   :  { %v2781_v28 = vsel %vm2430_vm3, %v3362_v10, %v3363_v20  ;;  %v2880_v24 = vsel %vm2537_vm11, %v3367_v16, %v3368_v35 }
 0x35d   :  { %v3381_v18 = vpop.permute.xlu0 %3380  ;;  %v3371_v37 = vpop.permute.xlu1 %3370 }
 0x35e   :  { %v3383_v3 = vunpack.i.h.bf16 %v3381_v18  ;;  %v3382_v38 = vunpack.i.l.bf16 %v3381_v18  ;;  %v3373_v40 = vunpack.i.h.bf16 %v3371_v37  ;;  %v3372_v47 = vunpack.i.l.bf16 %v3371_v37 }
 0x360   :  { %v2878_v43 = vsel %vm2537_vm11, %v3382_v38, %v3383_v3  ;;  %v2779_v44 = vsel %vm2430_vm3, %v3372_v47, %v3373_v40 }
 0x361   :  { %v3284_v51 = vpack.c.bf16 %v2880_v24, %v2878_v43  ;;  %v3278_v32 = vpack.c.bf16 %v2781_v28, %v2779_v44 }
 0x363   :  { %3280 = vmatprep.subr.msk.bf16.mxu1 %vm4378_vm4, %v3278_v32  ;;  %3286 = vmatprep.subr.msk.bf16.mxu0 %vm4378_vm4, %v3284_v51 }
 0x37a   :  { %v3386_v50 = vpop.permute.xlu0 %3385  ;;  %v3376_v41 = vpop.permute.xlu1 %3375 }
 0x37b   :  { %v3388_v22 = vunpack.i.h.bf16 %v3386_v50  ;;  %v3387_v17 = vunpack.i.l.bf16 %v3386_v50  ;;  %v3378_v8 = vunpack.i.h.bf16 %v3376_v41  ;;  %v3377_v57 = vunpack.i.l.bf16 %v3376_v41 }
 0x37d   :  { %v2879_v46 = vsel %vm2537_vm11, %v3388_v22, %v3367_v16  ;;  %v2877_v11 = vsel %vm2537_vm11, %v3387_v17, %v3382_v38  ;;  %v2780_v14 = vsel %vm2430_vm3, %v3378_v8, %v3362_v10  ;;  %v2778_v5 = vsel %vm2430_vm3, %v3377_v57, %v3372_v47 }
 0x37e   :  { %v3287_v58 = vpack.c.bf16 %v2879_v46, %v2877_v11  ;;  %v3281_v52 = vpack.c.bf16 %v2780_v14, %v2778_v5  ;;  %v3391_v42 = vpop.permute.xlu0 %3390  ;;  %v3396_v49 = vpop.permute.xlu1 %3395 }
 0x37f   :  { %v3393_v29 = vunpack.i.h.bf16 %v3391_v42  ;;  %v3392_v36 = vunpack.i.l.bf16 %v3391_v42  ;;  %v3398_v7 = vunpack.i.h.bf16 %v3396_v49  ;;  %v3397_v13 = vunpack.i.l.bf16 %v3396_v49 }
 0x380   :  { %3283 = vmatpush1.bf16.msk.msra.mxu1 %vm4378_vm4, %v3281_v52  ;;  %3289 = vmatpush1.bf16.msk.msra.mxu0 %vm4378_vm4, %v3287_v58 }
 0x381   :  { %v2979_v45 = vsel %vm2638_vm13, %v3392_v36, %v3393_v29  ;;  %v2977_v6 = vsel %vm2638_vm13, %v3397_v13, %v3398_v7 }
 0x382   :  { %v3290_v15 = vpack.c.bf16 %v2979_v45, %v2977_v6  ;;  %v3401_v55 = vpop.permute.xlu1 %3400 }
 0x383   :  { %v3403_v54 = vunpack.i.h.bf16 %v3401_v55  ;;  %v3402_v30 = vunpack.i.l.bf16 %v3401_v55  ;;  %3131 = vmatmul.mubr.msk.f32.vlgmr.msra.gmra.mrb[18].mxu1 %vm2437_vm14, %v2759_v48  ;;  %3135 = vmatmul.mubr.msk.f32.vlgmr.msra.gmra.mrb[20].mxu0 %vm2437_vm14, %v3132_v39 }
 0x384   :  { %3292 = vmatprep.subr.msk.bf16.mxu1 %vm4378_vm4, %v3290_v15  ;;  %3053 = vmatprep.mubr.f32.mxu1 %v3482_v0 }
 0x385   :  { %v2978_v19 = vsel %vm2638_vm13, %v3403_v54, %v3392_v36  ;;  %v2976_v21 = vsel %vm2638_vm13, %v3402_v30, %v3397_v13 }
 0x386   :  { %v3293_v23 = vpack.c.bf16 %v2978_v19, %v2976_v21 }
 0x388   :  { %3295 = vmatpush1.bf16.msk.msra.mxu1 %vm4378_vm4, %v3293_v23 }
 0x38b   :  { %3139 = vmatmul.mubr.msk.f32.vlgmr.msra.gmra.mrb[20].mxu1 %vm2437_vm14, %v3136_v25 }
 0x38f   :  { %v2734_v35 = vpop.permute.xlu0 %2733 }
 0x393   :  { %v2741_v3 = vpop.permute.xlu1 %2740 }
 0x406   :  { %v2512_v63 = vpop.f32.mrb[16].mxu0  ;;  %v2617_v60 = vpop.f32.mrb[16].mxu1 }
 0x407   :  { %v2521_v26 = vsel %vm4470_vm5, %v2512_v63, 0.0  ;;  %v2514_v62 = vpop.f32.mrb[17].mxu0  ;;  %v2619_v2 = vpop.f32.mrb[17].mxu1 }
 0x408   :  { %v2522_v12 = vsel %vm4474_vm7, %v2514_v62, 0.0  ;;  %v2622_v53 = vadd.f32 %v2617_v60, %v2521_v26 }
 0x409   :  { %v2623_v31 = vadd.f32 %v2619_v2, %v2522_v12 }
 0x40e   :  { %v2718_v33 = vpop.f32.mrb[18].mxu0 }
 0x40f   :  { %v2727_v20 = vsel %vm4482_vm8, %v2718_v33, 0.0  ;;  %v2720_v10 = vpop.f32.mrb[19].mxu0 }
 0x410   :  { %v2729_v16 = vadd.f32 %v2727_v20, %v2622_v53  ;;  %v2728_v18 = vsel %vm4486_vm9, %v2720_v10, 0.0 }
 0x411   :  { %v2730_v37 = vadd.f32 %v2728_v18, %v2623_v31 }
 0x412   :  { %v2736_v38 = vmul.f32 %v2734_v35, %v2729_v16 }
 0x413   :  { %v2737_v40 = vmul.f32 %v2734_v35, %v2730_v37 }
 0x414   :  { %v2743_v47 = vadd.f32 %v2741_v3, %v2736_v38 }
 0x415   :  { %v2744_v28 = vadd.f32 %v2741_v3, %v2737_v40 }
 0x416   :  { %v2745_v24 = vmax.f32 %v2743_v47, 0.0 }
 0x417   :  { %v2746_v43 = vmax.f32 %v2744_v28, 0.0 }
 0x419   :  { %v2749_v44 = vcombine.low %v2745_v24, %v2746_v43 }
 0x41b   :  { %2751 = vst [vmem:[#allocation9] sm:$0xff] %v2749_v44 }
 0x456   :  { %v2857_v51 = vpop.f32.mrb[18].mxu1  ;;  %v2956_v32 = vpop.f32.mrb[20].mxu0 }
 0x457   :  { %v2862_v50 = vsel %vm4470_vm5, %v2857_v51, 0.0  ;;  %v2859_v41 = vpop.f32.mrb[19].mxu1  ;;  %v2958_v22 = vpop.f32.mrb[21].mxu0 }
 0x458   :  { %v2863_v17 = vsel %vm4474_vm7, %v2859_v41, 0.0  ;;  %v2961_v8 = vadd.f32 %v2956_v32, %v2862_v50 }
 0x459   :  { %v2962_v57 = vadd.f32 %v2958_v22, %v2863_v17 }
 0x45e   :  { %v3055_v46 = vpop.f32.mrb[20].mxu1 }
 0x45f   :  { %v3060_v11 = vsel %vm4482_vm8, %v3055_v46, 0.0  ;;  %v3057_v14 = vpop.f32.mrb[21].mxu1 }
 0x460   :  { %v3062_v5 = vadd.f32 %v3060_v11, %v2961_v8  ;;  %v3061_v58 = vsel %vm4486_vm9, %v3057_v14, 0.0 }
 0x461   :  { %v3063_v52 = vadd.f32 %v3061_v58, %v2962_v57 }
 0x462   :  { %v3064_v42 = vmul.f32 %v3062_v5, %v2734_v35 }
 0x463   :  { %v3065_v49 = vmul.f32 %v3063_v52, %v2734_v35 }
 0x464   :  { %v3066_v29 = vadd.f32 %v3064_v42, %v2741_v3 }
 0x465   :  { %v3067_v36 = vadd.f32 %v3065_v49, %v2741_v3 }
 0x466   :  { %v3068_v7 = vmax.f32 %v3066_v29, 0.0 }
 0x467   :  { %v3069_v13 = vmax.f32 %v3067_v36, 0.0 }
 0x469   :  { %v3072_v48 = vcombine.low %v3068_v7, %v3069_v13 }
 0x46b   :  { %3075 = vst [vmem:[#allocation9 + $0x8] sm:$0xff] %v3072_v48 }
 0x46c   :  { %3461 = shalt.err (!%p3458_p6)
}
 0x46d   :  { %s3462_s8 = scalar_lea.hbm %s4524_s7, 256 }
 0x46e   :  { %p3463_p7 = scmp.ne.s32.totalorder %s4524_s7, %s3462_s8  ;;  %p3466_p8 = scmp.lt.u32.totalorder %s3462_s8, %s4524_s7 }
 0x470   :  { %p3468_p9 = pnand %p3466_p8, %p3463_p7 }
 0x472   :  { %3471 = shalt.err (!%p3468_p9)
}
 0x473   :  { %3087 = dma.vmem_to_hbm [thread:$0]  %s3082_s28, 256, %s4524_s7, [#allocation6], %s3479_s11, %s3479_s11, %s3480_s12  }
 0x474   :  { %3476 = dma.done.wait [#allocation6], 256  }
 0x475   :  { %3477 = vsyncadd [#allocation6], 4294967040 }
 0x476   :  { %3091 = vsyncpa [#allocation5], 1 }
 0x477   :  { %3092 = vsyncpa [#allocation8], 1 }
 0x478   :  { %3093 = vsyncpa [#allocation6], 1 }

</bundles_post_ra>
